<compile_context>
chip_gen: v6e
topology: v6e:2x2x1
jax: 0.10.0
libtpu: 0.0.40
codegen_flags: <defaults>
</compile_context>

<pallas_src>
import jax
import jax.numpy as jnp
from jax.experimental import pallas as pl
from jax.experimental.pallas import tpu as pltpu

H1, H2, H3 = 1024, 512, 256


def _round_up(x, m):
    return ((x + m - 1) // m) * m


def bow_kernel(alpha_ref,                      # SMEM: (3,) PReLU alphas
               x_ref, w1_ref, b1_ref,          # K-streamed
               w2_ref, b2_ref,                 # VMEM-resident
               w3_ref, b3_ref,
               w4_ref, b4_ref,
               o_ref,                          # (B, 1) output (resident)
               acc_ref):                       # (B, 1024) f32 accumulator
    k = pl.program_id(0)

    @pl.when(k == 0)
    def _():
        acc_ref[...] = jnp.zeros_like(acc_ref)

    # TODO(synk): dropout is identity here (eval-mode semantics); training-mode
    # stochastic dropout would use pltpu.prng_seed / prng_random_bits.

    # Partial x @ W1 over this vocab tile: bf16 MXU inputs, f32 accumulation.
    xt = x_ref[...].astype(jnp.bfloat16)
    acc_ref[...] += jnp.dot(xt, w1_ref[...], preferred_element_type=jnp.float32)

    @pl.when(k == pl.num_programs(0) - 1)
    def _():
        # Read PReLU alphas once from SMEM.
        a1 = alpha_ref[0]
        a2 = alpha_ref[1]
        a3 = alpha_ref[2]

        # Linear(V, 1024) bias + PReLU
        h = acc_ref[...] + b1_ref[...]
        h = jnp.where(h > 0, h, a1 * h)

        # Linear(1024, 512) + PReLU
        h = jnp.dot(h.astype(jnp.bfloat16), w2_ref[...],
                    preferred_element_type=jnp.float32) + b2_ref[...]
        h = jnp.where(h > 0, h, a2 * h)

        # Linear(512, 256) + PReLU
        h = jnp.dot(h.astype(jnp.bfloat16), w3_ref[...],
                    preferred_element_type=jnp.float32) + b3_ref[...]
        h = jnp.where(h > 0, h, a3 * h)

        # Linear(256, 1) + Sigmoid: N=1 MXU shape is degenerate, so do a VPU
        # broadcast-multiply + lane reduction with w4 stored as (1, 256).
        logits = jnp.sum(h * w4_ref[...], axis=-1, keepdims=True) + b4_ref[...]
        o_ref[...] = jax.nn.sigmoid(logits)


def bow_forward(x, params, *, k_tile=1024):
    """x: [B, V] float32.  params: dict (bf16 W1/W2/W3, (1,256) f32 W4, f32 biases, alphas)."""
    B, V = x.shape

    # Pad batch to a sublane multiple and vocab to a K-tile multiple.
    k_tile = _round_up(k_tile, 256)
    TK = min(k_tile, _round_up(V, 256))
    V_pad = _round_up(V, TK)
    B_pad = _round_up(max(B, 8), 8)
    if (B_pad, V_pad) != (B, V):
        x = jnp.pad(x, ((0, B_pad - B), (0, V_pad - V)))
    w1 = params["w1"]
    if V_pad != V:
        w1 = jnp.pad(w1, ((0, V_pad - V), (0, 0)))
    num_k = V_pad // TK

    grid_spec = pltpu.PrefetchScalarGridSpec(
        num_scalar_prefetch=0,
        grid=(num_k,),
        in_specs=[
            pl.BlockSpec(memory_space=pltpu.MemorySpace.SMEM),       # alphas
            pl.BlockSpec((B_pad, TK), lambda k: (0, k)),             # x  (K-streamed)
            pl.BlockSpec((TK, H1),    lambda k: (k, 0)),             # w1 (K-streamed)
            pl.BlockSpec((1, H1),     lambda k: (0, 0)),             # b1 (resident)
            pl.BlockSpec((H1, H2),    lambda k: (0, 0)),             # w2 (resident)
            pl.BlockSpec((1, H2),     lambda k: (0, 0)),             # b2
            pl.BlockSpec((H2, H3),    lambda k: (0, 0)),             # w3 (resident)
            pl.BlockSpec((1, H3),     lambda k: (0, 0)),             # b3
            pl.BlockSpec((1, H3),     lambda k: (0, 0)),             # w4 row vector
            pl.BlockSpec((1, 1),      lambda k: (0, 0)),             # b4
        ],
        out_specs=pl.BlockSpec((B_pad, 1), lambda k: (0, 0)),
        scratch_shapes=[pltpu.VMEM((B_pad, H1), jnp.float32)],
    )

    out = pl.pallas_call(
        bow_kernel,
        out_shape=jax.ShapeDtypeStruct((B_pad, 1), jnp.float32),
        grid_spec=grid_spec,
        compiler_params=pltpu.CompilerParams(
            dimension_semantics=("arbitrary",),   # K is a reduction axis
            vmem_limit_bytes=32 << 20,            # sized to tiled footprint (v7x-safe)
        ),
    )(params["alphas"], x, w1,
      params["b1"], params["w2"], params["b2"],
      params["w3"], params["b3"], params["w4"], params["b4"])
    return out[:B]


def init_params(key, vector_dim):
    """Init mirroring PyTorch nn.Linear defaults (U(-1/sqrt(fan_in), +)).

    Weights are stored pre-transposed as [in, out]; W1/W2/W3 in bf16, the tiny
    W4 as an f32 (1, 256) row vector for the in-kernel lane reduction.
    """
    dims = [(vector_dim, H1), (H1, H2), (H2, H3), (H3, 1)]
    params = {}
    keys = jax.random.split(key, 2 * len(dims))
    for i, (fan_in, fan_out) in enumerate(dims):
        bound = 1.0 / (fan_in ** 0.5)
        w = jax.random.uniform(keys[2 * i], (fan_in, fan_out),
                               minval=-bound, maxval=bound, dtype=jnp.float32)
        b = jax.random.uniform(keys[2 * i + 1], (1, fan_out),
                               minval=-bound, maxval=bound, dtype=jnp.float32)
        if i < 3:
            params[f"w{i + 1}"] = w.astype(jnp.bfloat16)
        else:
            params["w4"] = w.reshape(1, fan_in)        # (1, 256) f32 row
        params[f"b{i + 1}"] = b
    # nn.PReLU() default: single parameter initialized to 0.25 (3 PReLU layers)
    params["alphas"] = jnp.full((3,), 0.25, dtype=jnp.float32)
    return params


def bow_reference(x, params):
    """Pure-JAX reference using the identical numeric path (bf16 weights, f32 acc)."""
    a = params["alphas"]
    h = jnp.dot(x.astype(jnp.bfloat16), params["w1"],
                preferred_element_type=jnp.float32) + params["b1"]
    h = jnp.where(h > 0, h, a[0] * h)
    h = jnp.dot(h.astype(jnp.bfloat16), params["w2"],
                preferred_element_type=jnp.float32) + params["b2"]
    h = jnp.where(h > 0, h, a[1] * h)
    h = jnp.dot(h.astype(jnp.bfloat16), params["w3"],
                preferred_element_type=jnp.float32) + params["b3"]
    h = jnp.where(h > 0, h, a[2] * h)
    logits = jnp.sum(h * params["w4"], axis=-1, keepdims=True) + params["b4"]
    return jax.nn.sigmoid(logits)


if __name__ == "__main__":
    key = jax.random.PRNGKey(0)
    k_x, k_p = jax.random.split(key)

    batch = 8
    vector_dim = 300                     # deliberately not a multiple of the K tile
    x = jax.random.normal(k_x, (batch, vector_dim), dtype=jnp.float32)
    params = init_params(k_p, vector_dim)

    # Small k_tile so the demo exercises the multi-step K-reduction grid.
    out = bow_forward(x, params, k_tile=256)
    out = jax.block_until_ready(out)

    ref = bow_reference(x, params)
    assert out.shape == (batch, 1), out.shape
    assert jnp.allclose(out, ref, atol=2e-3, rtol=2e-3), (out, ref)

    print("KERNEL_OK")
</pallas_src>

<mosaic_0001>
module attributes {stable_mosaic.version = 11 : i64} {
  func.func @bow_kernel(%arg0: i32, %arg1: memref<3xf32, #tpu.memory_space<smem>>, %arg2: memref<8x256xf32, #tpu.memory_space<vmem>>, %arg3: memref<256x1024xbf16, #tpu.memory_space<vmem>>, %arg4: memref<1x1024xf32, #tpu.memory_space<vmem>>, %arg5: memref<1024x512xbf16, #tpu.memory_space<vmem>>, %arg6: memref<1x512xf32, #tpu.memory_space<vmem>>, %arg7: memref<512x256xbf16, #tpu.memory_space<vmem>>, %arg8: memref<1x256xf32, #tpu.memory_space<vmem>>, %arg9: memref<1x256xf32, #tpu.memory_space<vmem>>, %arg10: memref<1x1xf32, #tpu.memory_space<vmem>>, %arg11: memref<8x1xf32, #tpu.memory_space<vmem>>, %arg12: memref<8x1024xf32, #tpu.memory_space<vmem>>) attributes {dimension_semantics = [#tpu.dimension_semantics<arbitrary>], iteration_bounds = array<i64: 2>, scalar_prefetch = 0 : i64, scratch_operands = 1 : i64, tpu.core_type = #tpu.core_type<tc>, window_params = [{transform_indices = @transform_0, window_bounds = array<i64: 3>}, {transform_indices = @transform_1, window_bounds = array<i64: 8, 256>}, {transform_indices = @transform_2, window_bounds = array<i64: 256, 1024>}, {pipeline_mode = #tpu.pipeline_mode<synchronous>, transform_indices = @transform_3, window_bounds = array<i64: 1, 1024>}, {pipeline_mode = #tpu.pipeline_mode<synchronous>, transform_indices = @transform_4, window_bounds = array<i64: 1024, 512>}, {pipeline_mode = #tpu.pipeline_mode<synchronous>, transform_indices = @transform_5, window_bounds = array<i64: 1, 512>}, {pipeline_mode = #tpu.pipeline_mode<synchronous>, transform_indices = @transform_6, window_bounds = array<i64: 512, 256>}, {pipeline_mode = #tpu.pipeline_mode<synchronous>, transform_indices = @transform_7, window_bounds = array<i64: 1, 256>}, {pipeline_mode = #tpu.pipeline_mode<synchronous>, transform_indices = @transform_8, window_bounds = array<i64: 1, 256>}, {pipeline_mode = #tpu.pipeline_mode<synchronous>, transform_indices = @transform_9, window_bounds = array<i64: 1, 1>}, {pipeline_mode = #tpu.pipeline_mode<synchronous>, transform_indices = @transform_10, window_bounds = array<i64: 8, 1>}]} {
    %c0_i32 = arith.constant 0 : i32
    %0 = arith.cmpi eq, %arg0, %c0_i32 : i32
    %1 = arith.extui %0 : i1 to i32
    %c0_i32_0 = arith.constant 0 : i32
    %2 = arith.cmpi ne, %1, %c0_i32_0 : i32
    scf.if %2 {
      %cst_9 = arith.constant 0.000000e+00 : f32
      %13 = vector.broadcast %cst_9 : f32 to vector<8x1024xf32>
      %c0_10 = arith.constant 0 : index
      %c0_11 = arith.constant 0 : index
      %14 = vector.load %arg12[%c0_10, %c0_11] : memref<8x1024xf32, #tpu.memory_space<vmem>>, vector<8x1024xf32>
      tpu.vector_store %arg12[%c0_10, %c0_11], %13 {strides = array<i32>} : memref<8x1024xf32, #tpu.memory_space<vmem>>, vector<8x1024xf32>,
    } else {
    }
    %c0 = arith.constant 0 : index
    %c0_1 = arith.constant 0 : index
    %3 = vector.load %arg2[%c0, %c0_1] : memref<8x256xf32, #tpu.memory_space<vmem>>, vector<8x256xf32>
    %4 = arith.truncf %3 : vector<8x256xf32> to vector<8x256xbf16>
    %c0_2 = arith.constant 0 : index
    %c0_3 = arith.constant 0 : index
    %5 = vector.load %arg12[%c0_2, %c0_3] : memref<8x1024xf32, #tpu.memory_space<vmem>>, vector<8x1024xf32>
    %c0_4 = arith.constant 0 : index
    %c0_5 = arith.constant 0 : index
    %6 = vector.load %arg3[%c0_4, %c0_5] : memref<256x1024xbf16, #tpu.memory_space<vmem>>, vector<256x1024xbf16>
    %cst = arith.constant dense<0.000000e+00> : vector<8x1024xf32>
    %7 = tpu.matmul %4, %6, %cst {dimension_numbers = #tpu.dot_dimension_numbers<[1], [0], [0], [1], [0, 0, 1, 1], [], []>} : vector<8x256xbf16>, vector<256x1024xbf16>, vector<8x1024xf32> -> vector<8x1024xf32>
    %8 = arith.addf %5, %7 : vector<8x1024xf32>
    %c0_6 = arith.constant 0 : index
    %c0_7 = arith.constant 0 : index
    %9 = vector.load %arg12[%c0_6, %c0_7] : memref<8x1024xf32, #tpu.memory_space<vmem>>, vector<8x1024xf32>
    tpu.vector_store %arg12[%c0_6, %c0_7], %8 {strides = array<i32>} : memref<8x1024xf32, #tpu.memory_space<vmem>>, vector<8x1024xf32>,
    %c1_i32 = arith.constant 1 : i32
    %10 = arith.cmpi eq, %arg0, %c1_i32 : i32
    %11 = arith.extui %10 : i1 to i32
    %c0_i32_8 = arith.constant 0 : i32
    %12 = arith.cmpi ne, %11, %c0_i32_8 : i32
    scf.if %12 {
      %c0_9 = arith.constant 0 : index
      %13 = memref.load %arg1[%c0_9] : memref<3xf32, #tpu.memory_space<smem>>
      %c1 = arith.constant 1 : index
      %14 = memref.load %arg1[%c1] : memref<3xf32, #tpu.memory_space<smem>>
      %c2 = arith.constant 2 : index
      %15 = memref.load %arg1[%c2] : memref<3xf32, #tpu.memory_space<smem>>
      %c0_10 = arith.constant 0 : index
      %c0_11 = arith.constant 0 : index
      %16 = vector.load %arg12[%c0_10, %c0_11] : memref<8x1024xf32, #tpu.memory_space<vmem>>, vector<8x1024xf32>
      %c0_12 = arith.constant 0 : index
      %c0_13 = arith.constant 0 : index
      %17 = vector.load %arg4[%c0_12, %c0_13] : memref<1x1024xf32, #tpu.memory_space<vmem>>, vector<1x1024xf32>
      %18 = vector.broadcast %17 : vector<1x1024xf32> to vector<8x1024xf32>
      %19 = arith.addf %16, %18 : vector<8x1024xf32>
      %cst_14 = arith.constant 0.000000e+00 : f32
      %20 = vector.broadcast %cst_14 : f32 to vector<8x1024xf32>
      %21 = arith.cmpf ogt, %19, %20 : vector<8x1024xf32>
      %22 = vector.broadcast %13 : f32 to vector<8x1024xf32>
      %23 = arith.mulf %22, %19 : vector<8x1024xf32>
      %24 = arith.select %21, %19, %23 : vector<8x1024xi1>, vector<8x1024xf32>
      %25 = arith.truncf %24 : vector<8x1024xf32> to vector<8x1024xbf16>
      %c0_15 = arith.constant 0 : index
      %c0_16 = arith.constant 0 : index
      %26 = vector.load %arg5[%c0_15, %c0_16] : memref<1024x512xbf16, #tpu.memory_space<vmem>>, vector<1024x512xbf16>
      %cst_17 = arith.constant dense<0.000000e+00> : vector<8x512xf32>
      %27 = tpu.matmul %25, %26, %cst_17 {dimension_numbers = #tpu.dot_dimension_numbers<[1], [0], [0], [1], [0, 0, 1, 1], [], []>} : vector<8x1024xbf16>, vector<1024x512xbf16>, vector<8x512xf32> -> vector<8x512xf32>
      %c0_18 = arith.constant 0 : index
      %c0_19 = arith.constant 0 : index
      %28 = vector.load %arg6[%c0_18, %c0_19] : memref<1x512xf32, #tpu.memory_space<vmem>>, vector<1x512xf32>
      %29 = vector.broadcast %28 : vector<1x512xf32> to vector<8x512xf32>
      %30 = arith.addf %27, %29 : vector<8x512xf32>
      %cst_20 = arith.constant 0.000000e+00 : f32
      %31 = vector.broadcast %cst_20 : f32 to vector<8x512xf32>
      %32 = arith.cmpf ogt, %30, %31 : vector<8x512xf32>
      %33 = vector.broadcast %14 : f32 to vector<8x512xf32>
      %34 = arith.mulf %33, %30 : vector<8x512xf32>
      %35 = arith.select %32, %30, %34 : vector<8x512xi1>, vector<8x512xf32>
      %36 = arith.truncf %35 : vector<8x512xf32> to vector<8x512xbf16>
      %c0_21 = arith.constant 0 : index
      %c0_22 = arith.constant 0 : index
      %37 = vector.load %arg7[%c0_21, %c0_22] : memref<512x256xbf16, #tpu.memory_space<vmem>>, vector<512x256xbf16>
      %cst_23 = arith.constant dense<0.000000e+00> : vector<8x256xf32>
      %38 = tpu.matmul %36, %37, %cst_23 {dimension_numbers = #tpu.dot_dimension_numbers<[1], [0], [0], [1], [0, 0, 1, 1], [], []>} : vector<8x512xbf16>, vector<512x256xbf16>, vector<8x256xf32> -> vector<8x256xf32>
      %c0_24 = arith.constant 0 : index
      %c0_25 = arith.constant 0 : index
      %39 = vector.load %arg8[%c0_24, %c0_25] : memref<1x256xf32, #tpu.memory_space<vmem>>, vector<1x256xf32>
      %40 = vector.broadcast %39 : vector<1x256xf32> to vector<8x256xf32>
      %41 = arith.addf %38, %40 : vector<8x256xf32>
      %cst_26 = arith.constant 0.000000e+00 : f32
      %42 = vector.broadcast %cst_26 : f32 to vector<8x256xf32>
      %43 = arith.cmpf ogt, %41, %42 : vector<8x256xf32>
      %44 = vector.broadcast %15 : f32 to vector<8x256xf32>
      %45 = arith.mulf %44, %41 : vector<8x256xf32>
      %46 = arith.select %43, %41, %45 : vector<8x256xi1>, vector<8x256xf32>
      %c0_27 = arith.constant 0 : index
      %c0_28 = arith.constant 0 : index
      %47 = vector.load %arg9[%c0_27, %c0_28] : memref<1x256xf32, #tpu.memory_space<vmem>>, vector<1x256xf32>
      %48 = vector.broadcast %47 : vector<1x256xf32> to vector<8x256xf32>
      %49 = arith.mulf %46, %48 : vector<8x256xf32>
      %cst_29 = arith.constant dense<0.000000e+00> : vector<8xf32>
      %50 = vector.multi_reduction <add>, %49, %cst_29 [1] : vector<8x256xf32> to vector<8xf32>
      %51 = vector.shape_cast %50 : vector<8xf32> to vector<8x1xf32>
      %c0_30 = arith.constant 0 : index
      %c0_31 = arith.constant 0 : index
      %52 = vector.load %arg10[%c0_30, %c0_31] : memref<1x1xf32, #tpu.memory_space<vmem>>, vector<1x1xf32>
      %53 = vector.broadcast %52 : vector<1x1xf32> to vector<8x1xf32>
      %54 = arith.addf %51, %53 : vector<8x1xf32>
      %55 = arith.negf %54 : vector<8x1xf32>
      %56 = math.exp %55 : vector<8x1xf32>
      %cst_32 = arith.constant 1.000000e+00 : f32
      %57 = vector.broadcast %cst_32 : f32 to vector<8x1xf32>
      %58 = arith.addf %57, %56 : vector<8x1xf32>
      %59 = arith.divf %57, %58 : vector<8x1xf32>
      %c0_33 = arith.constant 0 : index
      %c0_34 = arith.constant 0 : index
      %60 = vector.load %arg11[%c0_33, %c0_34] : memref<8x1xf32, #tpu.memory_space<vmem>>, vector<8x1xf32>
      tpu.vector_store %arg11[%c0_33, %c0_34], %59 {strides = array<i32>} : memref<8x1xf32, #tpu.memory_space<vmem>>, vector<8x1xf32>,
    } else {
    }
    return
  }
  func.func @transform_0(%arg0: i32) -> i32 {
    %c0_i32 = arith.constant 0 : i32
    %c0_i32_0 = arith.constant 0 : i32
    return %c0_i32 : i32
  }
  func.func @transform_1(%arg0: i32) -> (i32, i32) {
    %c0_i32 = arith.constant 0 : i32
    %c0_i32_0 = arith.constant 0 : i32
    return %c0_i32, %arg0 : i32, i32
  }
  func.func @transform_2(%arg0: i32) -> (i32, i32) {
    %c0_i32 = arith.constant 0 : i32
    %c0_i32_0 = arith.constant 0 : i32
    return %arg0, %c0_i32 : i32, i32
  }
  func.func @transform_3(%arg0: i32) -> (i32, i32) {
    %c0_i32 = arith.constant 0 : i32
    %c0_i32_0 = arith.constant 0 : i32
    %c0_i32_1 = arith.constant 0 : i32
    return %c0_i32, %c0_i32_0 : i32, i32
  }
  func.func @transform_4(%arg0: i32) -> (i32, i32) {
    %c0_i32 = arith.constant 0 : i32
    %c0_i32_0 = arith.constant 0 : i32
    %c0_i32_1 = arith.constant 0 : i32
    return %c0_i32, %c0_i32_0 : i32, i32
  }
  func.func @transform_5(%arg0: i32) -> (i32, i32) {
    %c0_i32 = arith.constant 0 : i32
    %c0_i32_0 = arith.constant 0 : i32
    %c0_i32_1 = arith.constant 0 : i32
    return %c0_i32, %c0_i32_0 : i32, i32
  }
  func.func @transform_6(%arg0: i32) -> (i32, i32) {
    %c0_i32 = arith.constant 0 : i32
    %c0_i32_0 = arith.constant 0 : i32
    %c0_i32_1 = arith.constant 0 : i32
    return %c0_i32, %c0_i32_0 : i32, i32
  }
  func.func @transform_7(%arg0: i32) -> (i32, i32) {
    %c0_i32 = arith.constant 0 : i32
    %c0_i32_0 = arith.constant 0 : i32
    %c0_i32_1 = arith.constant 0 : i32
    return %c0_i32, %c0_i32_0 : i32, i32
  }
  func.func @transform_8(%arg0: i32) -> (i32, i32) {
    %c0_i32 = arith.constant 0 : i32
    %c0_i32_0 = arith.constant 0 : i32
    %c0_i32_1 = arith.constant 0 : i32
    return %c0_i32, %c0_i32_0 : i32, i32
  }
  func.func @transform_9(%arg0: i32) -> (i32, i32) {
    %c0_i32 = arith.constant 0 : i32
    %c0_i32_0 = arith.constant 0 : i32
    %c0_i32_1 = arith.constant 0 : i32
    return %c0_i32, %c0_i32_0 : i32, i32
  }
  func.func @transform_10(%arg0: i32) -> (i32, i32) {
    %c0_i32 = arith.constant 0 : i32
    %c0_i32_0 = arith.constant 0 : i32
    %c0_i32_1 = arith.constant 0 : i32
    return %c0_i32, %c0_i32_0 : i32, i32
  }
}

</mosaic_0001>

<bundles_post_ra>
// kernel: tpu_custom_call.1
= control target key start
LH: loop header
LB: loop body
LE: loop exit
PB: predicated region body
PF: predicated region fallthrough
CT: control target
= control target key end

     0   :  { %s5875_s0 = inlined_call_operand.vmem [shape: f32[3], index: 0, kind: input, shape index: {}]   ;;  %s5876_s1 = inlined_call_operand.hbm [shape: f32[8,512], index: 1, kind: input, shape index: {}]   ;;  %s5877_s2 = inlined_call_operand.hbm [shape: bf16[512,1024], index: 2, kind: input, shape index: {}]   ;;  %s5878_s3 = inlined_call_operand.hbm [shape: f32[1,1024], index: 3, kind: input, shape index: {}]   ;;  %s5879_s4 = inlined_call_operand.hbm [shape: bf16[1024,512], index: 4, kind: input, shape index: {}]   ;;  %s5880_s5 = inlined_call_operand.vmem [shape: f32[1,512], index: 5, kind: input, shape index: {}]   ;;  %s5881_s6 = inlined_call_operand.hbm [shape: bf16[512,256], index: 6, kind: input, shape index: {}]   ;;  %s5882_s7 = inlined_call_operand.vmem [shape: f32[1,256], index: 7, kind: input, shape index: {}]   ;;  %s5883_s8 = inlined_call_operand.vmem [shape: f32[1,256], index: 8, kind: input, shape index: {}]   ;;  %s5884_s9 = inlined_call_operand.<no memory space> [shape: f32[1,1], index: 9, kind: input, shape index: {}]   ;;  %s5885_s10 = inlined_call_operand.vmem [shape: f32[8,1], index: 10, kind: output, shape index: {}]  }
   0x1   :  { %5889 = sst [smem:[#allocation19_spill]] %s5875_s0  ;;  %v15_v0 = vstv %s5884_s9 }
   0x2   :  { %16 = vst [vmem:[#allocation3] sm:$0x1] %v15_v0 }
   0x3   :  { %17 = vsyncpa [#allocation6], 0 }
   0x4   :  { %18 = vsyncpa [#allocation5], 0 }
   0x5   :  { %20 = vsyncpa [#allocation5 + $0x1], 0 }
   0x6   :  { %21 = vsyncpa [#allocation9], 0 }
   0x7   :  { %23 = vsyncpa [#allocation9 + $0x1], 0 }
   0x8   :  { %24 = vsyncpa [#allocation12], 0  ;;  %s5384_s15 = smov 0   ;;  %s5386_s16 = smov 0  }
   0x9   :  { %s5388_s17 = smov 0   ;;  %s5390_s18 = smov 0  }
   0xa LB: > { %s5313_s9 = smov [#allocation10]   ;;  %s5405_s20 = sadd.s32 4294967295, %s5311_s18   ;;  %s5311_s18 = sphi %s5390_s18, %s5907_s18   ;;  %s5307_s17 = sphi %s5388_s17, %s5906_s17   ;;  %s5303_s16 = sphi %s5386_s16, %s5905_s16   ;;  %s5299_s15 = sphi %s5384_s15, %s5904_s15  }
   0xb   : > { %s300_s19 = sshll.u32 %s5313_s9, 4  ;;  %p4057_p0 = scmp.ge.s32.totalorder %s5311_s18, 1  ;;  %s301_s19 = int_to_ptr.vmem [resolvable:$true] %s300_s19 }
   0xc   : > { %p5886_p1 = scmp.eq.s32.totalorder %s5405_s20, 0  ;;  %p276_p2 = scmp.lt.s32.totalorder %s5311_s18, 3 }
   0xd   : > { %s5314_s22 = smov [#allocation11]   ;;  %s5892_s0 = sld [smem:[#allocation19_spill]] }
   0xe   : > { %p5411_p4 = pnand %p4057_p0, %p276_p2  ;;  %s310_s23 = sshll.u32 %s5314_s22, 4  ;;  %s5417_s23 = int_to_ptr.vmem [resolvable:$true] %s310_s23 }
   0xf   : > { %s5123_s28 = scalar_lea.vmem %s301_s19, 128  ;;  %p5131_p11 = scmp.lt.s32.totalorder %s301_s19, %s301_s19 }
  0x10   : > { %s5890_s21 = scalar_select %p5411_p4, 1, 0 }
  0x11   : > { %p4556_p5 = pneg %p5411_p4  ;;  %p5124_p8 = scmp.ne.s32.totalorder %s301_s19, %s5123_s28 }
  0x12   : > { %p5132_p12 = scmp.lt.s32.totalorder %s5123_s28, %s5123_s28 }
  0x13   : > { %p5421_p6 = pnand %p4556_p5, %p5886_p1  ;;  %s289_s27 = sshll.u32 %s5892_s0, 4  ;;  %s5428_s27 = int_to_ptr.vmem [resolvable:$true] %s289_s27 }
  0x14   : > { %p5133_p13 = por %p5132_p12, %p5131_p11 }
  0x15   : > { %p5114_p7 = pneg %p5421_p6 }
  0x17   : > { %p5126_p9 = pnand %p5124_p8, %p5114_p7 }
  0x19   : > { %p5127_p10 = pneg %p5126_p9 }
  0x1b   : > { %p5134_p0 = pnand %p5133_p13, %p5127_p10 }
  0x1d   : > { %5137 = shalt.err (!%p5134_p0)
}
  0x1e   : > { %4562 = dma.hbm_to_vmem [thread:$0]  (!%p5421_p6), %s5878_s3, 128, %s301_s19, [#allocation9]  }
  0x1f   : > { %s5149_s11 = scalar_lea.vmem %s5417_s23, 32768  ;;  %p5157_p9 = scmp.lt.s32.totalorder %s5417_s23, %s5417_s23 }
  0x20   : > { %p5150_p2 = scmp.ne.s32.totalorder %s5417_s23, %s5149_s11  ;;  %p5158_p10 = scmp.lt.s32.totalorder %s5149_s11, %s5149_s11 }
  0x22   : > { %p5152_p5 = pnand %p5150_p2, %p5114_p7  ;;  %p5159_p11 = por %p5158_p10, %p5157_p9 }
  0x24   : > { %p5153_p8 = pneg %p5152_p5 }
  0x26   : > { %p5160_p12 = pnand %p5159_p11, %p5153_p8 }
  0x28   : > { %5163 = shalt.err (!%p5160_p12)
}
  0x29   : > { %s5315_s12 = smov 256   ;;  %s5316_s13 = smov 16  }
  0x2a   : > { %4565 = dma.hbm_to_vmem [thread:$0]  (!%p5421_p6), %s5879_s4, 32768, %s5417_s23, [#allocation12], %s5315_s12, %s5315_s12, %s5316_s13  }
  0x2b   : > { %s5164_s19 = scalar_lea.vmem %s5428_s27, 16  ;;  %p5172_p5 = scmp.lt.s32.totalorder %s5428_s27, %s5428_s27 }
  0x2c   : > { %p5165_p13 = scmp.ne.s32.totalorder %s5428_s27, %s5164_s19  ;;  %p5173_p8 = scmp.lt.s32.totalorder %s5164_s19, %s5164_s19 }
  0x2e   : > { %p5167_p0 = pnand %p5165_p13, %p5114_p7  ;;  %p5174_p9 = por %p5173_p8, %p5172_p5 }
  0x30   : > { %p5168_p2 = pneg %p5167_p0 }
  0x32   : > { %p5175_p10 = pnand %p5174_p9, %p5168_p2 }
  0x34   : > { %5178 = shalt.err (!%p5175_p10)
}
  0x35   : > { %s5317_s22 = smov [#allocation4]   ;;  %s5318_s25 = smov [#allocation13]  }
  0x36   : > { %4559 = dma.vmem_to_smem (!%p5421_p6), %s5428_s27, 16, %s5317_s22, [#allocation6]  }
  0x37   : > { %s326_s23 = sshll.u32 %s5318_s25, 4  ;;  %s327_s23 = int_to_ptr.vmem [resolvable:$true] %s326_s23 }
  0x38   : > { %s5190_s26 = scalar_lea.vmem %s327_s23, 8192  ;;  %p5198_p0 = scmp.lt.s32.totalorder %s327_s23, %s327_s23 }
  0x39   : > { %p5191_p11 = scmp.ne.s32.totalorder %s327_s23, %s5190_s26  ;;  %p5199_p3 = scmp.lt.s32.totalorder %s5190_s26, %s5190_s26 }
  0x3b   : > { %p5193_p12 = pnand %p5191_p11, %p5114_p7  ;;  %p5200_p5 = por %p5199_p3, %p5198_p0 }
  0x3d   : > { %p5194_p13 = pneg %p5193_p12 }
  0x3f   : > { %p5201_p2 = pnand %p5200_p5, %p5194_p13 }
  0x41   : > { %5204 = shalt.err (!%p5201_p2)
}
  0x42   : > { %s5319_s28 = smov 128   ;;  %s5320_s27 = smov 8  }
  0x43   : > { %4568 = dma.hbm_to_vmem [thread:$0]  (!%p5421_p6), %s5881_s6, 8192, %s327_s23, [#allocation12], %s5319_s28, %s5319_s28, %s5320_s27  }
  0x44   : > { %s5472_s11 = sadd.s32 1, %s5311_s18   ;;  %s58_s12 = sadd.s32 1, %s5307_s17 }
  0x45   : > { %s55_s13 = ssub.s32 %s5311_s18, %s5472_s11  ;;  %p65_p3 = scmp.ne.s32.totalorder %s5307_s17, %s5303_s16 }
  0x46   : > { %p56_p7 = scmp.eq.s32.totalorder %s55_s13, 0  ;;  %p66_p8 = scmp.eq.s32.totalorder %s5311_s18, 0 }
  0x47   : > { %p71_p9 = scmp.ne.s32.totalorder %s5303_s16, %s5299_s15  ;;  %p4580_p10 = scmp.lt.s32.totalorder %s5311_s18, 2 }
  0x48   : > { %s5484_s14 = scalar_select %p56_p7, %s5307_s17, %s58_s12  }
  0x49   : > { %p67_p11 = por %p66_p8, %p65_p3  ;;  %p5488_p12 = por %p5886_p1, %p71_p9 }
  0x4a   : > { %s5493_s9 = sand.u32 1, %s5307_s17   ;;  %s4533_s19 = sshll.u32 %s5311_s18, 8 }
  0x4b   : > { %s5893_s24 = scalar_select %p5488_p12, 1, 0 }
  0x4c   : > { %s4063_s22 = sshll.u32 %s5493_s9, 4  ;;  %s5500_s15 = scalar_lea.hbm %s5876_s1, %s4533_s19 }
  0x4d   : > { %s353_s26 = scalar_lea.vmem [#allocation7], %s4063_s22  ;;  %p5502_p6 = pnand %p4580_p10, %p67_p11 }
  0x4e   : > { %s361_s28 = sshll.u32 %s353_s26, 4  ;;  %s4066_s29 = sshll.u32 %s5493_s9, 10  ;;  %s362_s28 = int_to_ptr.vmem [resolvable:$true] %s361_s28 }
  0x4f   : > { %s350_s30 = scalar_lea.sflag [#allocation5], %s5493_s9  ;;  %s5205_s12 = scalar_lea.hbm %s5500_s15, 256 }
  0x50   : > { %p5206_p13 = scmp.ne.s32.totalorder %s5500_s15, %s5205_s12  ;;  %p5207_p0 = pneg %p5502_p6 }
  0x51   : > { %s5210_s22 = scalar_lea.hbm %s5876_s1, 512  ;;  %p5211_p3 = scmp.lt.s32.totalorder %s5500_s15, %s5876_s1 }
  0x52   : > { %p5208_p5 = pnand %p5207_p0, %p5206_p13  ;;  %p5212_p7 = scmp.lt.s32.totalorder %s5210_s22, %s5205_s12 }
  0x54   : > { %p5209_p2 = pneg %p5208_p5  ;;  %p5213_p8 = por %p5212_p7, %p5211_p3 }
  0x56   : > { %p5214_p9 = pnand %p5213_p8, %p5209_p2 }
  0x58   : > { %5217 = shalt.err (!%p5214_p9)
}
  0x59   : > { %s5218_s9 = scalar_lea.vmem %s362_s28, 256  ;;  %s5321_s26 = smov [#allocation7]  }
  0x5a   : > { %p5219_p10 = scmp.ne.s32.totalorder %s362_s28, %s5218_s9  ;;  %s5223_s0 = sshll.u32 %s5321_s26, 4  ;;  %s5224_s0 = int_to_ptr.vmem [resolvable:$false] %s5223_s0 }
  0x5b   : > { %s5225_s13 = scalar_lea.vmem %s5224_s0, 512  ;;  %p5226_p5 = scmp.lt.s32.totalorder %s362_s28, %s5224_s0 }
  0x5c   : > { %p5221_p11 = pnand %p5219_p10, %p5207_p0  ;;  %p5227_p1 = scmp.lt.s32.totalorder %s5225_s13, %s5218_s9 }
  0x5e   : > { %p5222_p13 = pneg %p5221_p11  ;;  %p5228_p12 = por %p5227_p1, %p5226_p5 }
  0x60   : > { %p5229_p4 = pnand %p5228_p12, %p5222_p13 }
  0x62   : > { %5232 = shalt.err (!%p5229_p4)
}
  0x63   : > { %4572 = dma.hbm_to_vmem [thread:$0]  (!%p5502_p6), %s5500_s15, 256, %s362_s28, %s350_s30  }
  0x64   : > { %s372_s12 = scalar_lea.vmem [#allocation8], %s4066_s29  ;;  %s368_s22 = sand.u32 1, %s5311_s18  }
  0x65   : > { %s380_s19 = sshll.u32 %s372_s12, 4  ;;  %s4535_s25 = sshll.u32 %s5311_s18, 14  ;;  %s5529_s19 = int_to_ptr.vmem [resolvable:$true] %s380_s19 }
  0x66   : > { %s5535_s0 = scalar_lea.hbm %s5877_s2, %s4535_s25  ;;  %s5537_s9 = scalar_lea.sflag [#allocation9], %s368_s22 }
  0x67   : > { %s5233_s13 = scalar_lea.hbm %s5535_s0, 16384  ;;  %s5238_s18 = scalar_lea.hbm %s5877_s2, 32768 }
  0x68   : > { %p5234_p1 = scmp.ne.s32.totalorder %s5535_s0, %s5233_s13  ;;  %p5239_p2 = scmp.lt.s32.totalorder %s5535_s0, %s5877_s2 }
  0x69   : > { %p5240_p3 = scmp.lt.s32.totalorder %s5238_s18, %s5233_s13 }
  0x6a   : > { %p5236_p4 = pnand %p5234_p1, %p5207_p0 }
  0x6b   : > { %p5241_p7 = por %p5240_p3, %p5239_p2 }
  0x6c   : > { %p5237_p12 = pneg %p5236_p4 }
  0x6e   : > { %p5242_p8 = pnand %p5241_p7, %p5237_p12 }
  0x70   : > { %5245 = shalt.err (!%p5242_p8)
}
  0x71   : > { %s5246_s12 = scalar_lea.vmem %s5529_s19, 16384  ;;  %s5322_s22 = smov [#allocation8]  }
  0x72   : > { %p5247_p9 = scmp.ne.s32.totalorder %s5529_s19, %s5246_s12  ;;  %s5251_s25 = sshll.u32 %s5322_s22, 4  ;;  %s5252_s25 = int_to_ptr.vmem [resolvable:$false] %s5251_s25 }
  0x73   : > { %s5253_s23 = scalar_lea.vmem %s5252_s25, 32768  ;;  %p5254_p13 = scmp.lt.s32.totalorder %s5529_s19, %s5252_s25 }
  0x74   : > { %p5249_p10 = pnand %p5247_p9, %p5207_p0  ;;  %p5255_p5 = scmp.lt.s32.totalorder %s5253_s23, %s5246_s12 }
  0x76   : > { %p5250_p11 = pneg %p5249_p10  ;;  %p5256_p1 = por %p5255_p5, %p5254_p13 }
  0x78   : > { %p5257_p4 = pnand %p5256_p1, %p5250_p11 }
  0x7a   : > { %5260 = shalt.err (!%p5257_p4)
}
  0x7b   : > { %s5323_s26 = smov 512   ;;  %s5324_s13 = smov 32  }
  0x7c   : > { %4575 = dma.hbm_to_vmem [thread:$0]  (!%p5502_p6), %s5535_s0, 16384, %s5529_s19, %s5537_s9, %s5323_s26, %s5323_s26, %s5324_s13  }
  0x7d   : > { %p5895_p0 = scmp.ne.s32.totalorder %s5890_s21, 0 }
  0x7e   : > { %p5896_p12 = scmp.eq.s32.totalorder (!%p5895_p0), %s5405_s20, 0 }
  0x7f   : > { %392 = sbr.rel (%p5895_p0) target bundleno = 1330 (0x532), region = 60 }
  0x84   : > { %5278 = dma.done.wait (%p5896_p12), [#allocation6], 16   ;;  %p5897_p2 = pmov %p5896_p12 }
  0x85   : > { %s398_s15 = sand.u32 1, %s5303_s16   ;;  %p5898_p3 = scmp.ne.s32.totalorder %s5893_s24, 0 }
  0x86   : > { %5280 = vsyncadd (%p5897_p2), [#allocation6], 4294967280  ;;  %s4072_s28 = sshll.u32 %s398_s15, 4  ;;  %s399_s18 = scalar_lea.sflag [#allocation5], %s398_s15 }
  0x87   : > { %s5569_s29 = scalar_lea.vmem [#allocation7], %s4072_s28 }
  0x88   : > { %5282 = dma.done.wait (%p5898_p3), %s399_s18, 256  }
  0x89   : > { %5284 = vsyncadd (%p5898_p3), %s399_s18, 4294967040  ;;  %s407_s21 = sand.u32 1, %s5405_s20   ;;  %s4073_s27 = sshll.u32 %s398_s15, 10 }
  0x8a   : > { %s408_s19 = scalar_lea.sflag [#allocation9], %s407_s21  ;;  %s5576_s0 = scalar_lea.vmem [#allocation8], %s4073_s27 }
  0x8b   : > { %5286 = dma.done.wait (%p5898_p3), %s408_s19, 16384  }
  0x8c   : > { %5288 = vsyncadd (%p5898_p3), %s408_s19, 4294950912  ;;  %p5899_p6 = pmov %p5897_p2 }
  0x8d   : > { %p5900_p7 = pmov %p5897_p2 }
  0x8e   : > { %5290 = dma.done.wait (%p5899_p6), [#allocation9], 128  }
  0x8f   : > { %5292 = vsyncadd (%p5900_p7), [#allocation9], 4294967168  ;;  %p5901_p8 = pmov %p5897_p2 }
  0x90   : > { %p5902_p9 = pmov %p5897_p2 }
  0x91   : > { %5294 = dma.done.wait (%p5901_p8), [#allocation12], 40960  }
  0x92   : > { %5296 = vsyncadd (%p5902_p9), [#allocation12], 4294926336 }
  0x93   : > { %428 = sfence }
  0x94   : > { %p5903_p10 = scmp.ne.s32.totalorder %s5405_s20, 0 }
  0x96   : > { %466 = sbr.rel (%p5903_p10) target bundleno = 160 (0xa0), region = 88 }
  0x9b   : > { %v5325_v1 = vmov 0.0  }
  0x9c   : > { %467 = vst [vmem:[#allocation2 + $0x30] sm:$0xff] %v5325_v1  ;;  %468 = vst [vmem:[#allocation2] sm:$0xff] %v5325_v1 }
  0x9d   : > { %469 = vst [vmem:[#allocation2 + $0x18] sm:$0xff] %v5325_v1  ;;  %470 = vst [vmem:[#allocation2 + $0x10] sm:$0xff] %v5325_v1 }
  0x9e   : > { %471 = vst [vmem:[#allocation2 + $0x8] sm:$0xff] %v5325_v1  ;;  %472 = vst [vmem:[#allocation2 + $0x20] sm:$0xff] %v5325_v1 }
  0x9f   : > { %473 = vst [vmem:[#allocation2 + $0x28] sm:$0xff] %v5325_v1  ;;  %474 = vst [vmem:[#allocation2 + $0x38] sm:$0xff] %v5325_v1 }
  0xa0 PF: > { %v543_v2 = vld [vmem:[%s5576_s0 + $0x1c0] sm:$0xff]  ;;  %v544_v4 = vld [vmem:[%s5576_s0 + $0x1c8] sm:$0xff]  ;;  %p4206_p11 = scmp.ne.s32.totalorder %s5405_s20, 1 }
  0xa1   : > { %v547_v3 = vld [vmem:[%s5576_s0 + $0x1e0] sm:$0xff]  ;;  %v548_v6 = vld [vmem:[%s5576_s0 + $0x1e8] sm:$0xff]  ;;  %s1439_s20 = sld [smem:[#allocation4]] (!%p4206_p11) }
  0xa2   : > { %v4135_v5 = vcombine.high %v543_v2, %v547_v3  ;;  %v4134_v7 = vcombine.low %v543_v2, %v547_v3  ;;  %v535_v8 = vld [vmem:[%s5576_s0 + $0x180] sm:$0xff]  ;;  %v4137_v10 = vcombine.high %v544_v4, %v548_v6  ;;  %v4136_v11 = vcombine.low %v544_v4, %v548_v6  ;;  %v536_v13 = vld [vmem:[%s5576_s0 + $0x188] sm:$0xff]  ;;  %s4207_s30 = sld [smem:[#allocation4 + $0x1]] (!%p4206_p11) }
  0xa3   : > { %v539_v9 = vld [vmem:[%s5576_s0 + $0x1a0] sm:$0xff]  ;;  %v540_v14 = vld [vmem:[%s5576_s0 + $0x1a8] sm:$0xff]  ;;  %s4208_s25 = sld [smem:[#allocation4 + $0x2]] (!%p4206_p11) }
  0xa4   : > { %v4127_v12 = vcombine.high %v535_v8, %v539_v9  ;;  %v527_v15 = vld [vmem:[%s5576_s0 + $0x140] sm:$0xff]  ;;  %1255 = vmatprep.subr.bf16.mxu0 %v4135_v5  ;;  %v4129_v16 = vcombine.high %v536_v13, %v540_v14  ;;  %v528_v18 = vld [vmem:[%s5576_s0 + $0x148] sm:$0xff]  ;;  %1296 = vmatprep.subr.bf16.mxu1 %v4137_v10  ;;  %v4126_v20 = vcombine.low %v535_v8, %v539_v9 }
  0xa5   : > { %v531_v17 = vld [vmem:[%s5576_s0 + $0x160] sm:$0xff]  ;;  %v532_v19 = vld [vmem:[%s5576_s0 + $0x168] sm:$0xff]  ;;  %1256 = vmatpush1.bf16.msra.mxu0 %v4134_v7  ;;  %1297 = vmatpush1.bf16.msra.mxu1 %v4136_v11  ;;  %v4128_v21 = vcombine.low %v536_v13, %v540_v14 }
  0xa6   : > { %1257 = vmatprep.subr.bf16.mxu0 %v4127_v12  ;;  %v4119_v22 = vcombine.high %v527_v15, %v531_v17  ;;  %1298 = vmatprep.subr.bf16.mxu1 %v4129_v16  ;;  %v4121_v23 = vcombine.high %v528_v18, %v532_v19  ;;  %v519_v24 = vld [vmem:[%s5576_s0 + $0x100] sm:$0xff]  ;;  %v520_v26 = vld [vmem:[%s5576_s0 + $0x108] sm:$0xff]  ;;  %v4118_v28 = vcombine.low %v527_v15, %v531_v17 }
  0xa7   : > { %v523_v25 = vld [vmem:[%s5576_s0 + $0x120] sm:$0xff]  ;;  %v524_v27 = vld [vmem:[%s5576_s0 + $0x128] sm:$0xff]  ;;  %v4120_v29 = vcombine.low %v528_v18, %v532_v19 }
  0xa8   : > { %v4111_v30 = vcombine.high %v519_v24, %v523_v25  ;;  %v4113_v31 = vcombine.high %v520_v26, %v524_v27  ;;  %v511_v32 = vld [vmem:[%s5576_s0 + $0xc0] sm:$0xff]  ;;  %v512_v34 = vld [vmem:[%s5576_s0 + $0xc8] sm:$0xff]  ;;  %v4110_v36 = vcombine.low %v519_v24, %v523_v25  ;;  %v4112_v37 = vcombine.low %v520_v26, %v524_v27 }
  0xa9   : > { %1258 = vmatpush1.bf16.msra.mxu0 %v4126_v20  ;;  %1299 = vmatpush1.bf16.msra.mxu1 %v4128_v21  ;;  %v515_v33 = vld [vmem:[%s5576_s0 + $0xe0] sm:$0xff]  ;;  %v516_v35 = vld [vmem:[%s5576_s0 + $0xe8] sm:$0xff] }
  0xaa   : > { %1259 = vmatprep.subr.bf16.mxu0 %v4119_v22  ;;  %1300 = vmatprep.subr.bf16.mxu1 %v4121_v23  ;;  %v4103_v38 = vcombine.high %v511_v32, %v515_v33  ;;  %v4105_v39 = vcombine.high %v512_v34, %v516_v35  ;;  %v503_v40 = vld [vmem:[%s5576_s0 + $0x80] sm:$0xff]  ;;  %v504_v42 = vld [vmem:[%s5576_s0 + $0x88] sm:$0xff]  ;;  %v4102_v44 = vcombine.low %v511_v32, %v515_v33 }
  0xab   : > { %v507_v41 = vld [vmem:[%s5576_s0 + $0xa0] sm:$0xff]  ;;  %v508_v43 = vld [vmem:[%s5576_s0 + $0xa8] sm:$0xff]  ;;  %v4104_v45 = vcombine.low %v512_v34, %v516_v35 }
  0xac   : > { %v4095_v46 = vcombine.high %v503_v40, %v507_v41  ;;  %v4097_v47 = vcombine.high %v504_v42, %v508_v43  ;;  %v495_v48 = vld [vmem:[%s5576_s0 + $0x40] sm:$0xff]  ;;  %v496_v50 = vld [vmem:[%s5576_s0 + $0x48] sm:$0xff]  ;;  %v4094_v52 = vcombine.low %v503_v40, %v507_v41  ;;  %v4096_v53 = vcombine.low %v504_v42, %v508_v43 }
  0xad   : > { %1260 = vmatpush1.bf16.msra.mxu0 %v4118_v28  ;;  %1301 = vmatpush1.bf16.msra.mxu1 %v4120_v29  ;;  %v499_v49 = vld [vmem:[%s5576_s0 + $0x60] sm:$0xff]  ;;  %v500_v51 = vld [vmem:[%s5576_s0 + $0x68] sm:$0xff] }
  0xae   : > { %1261 = vmatprep.subr.bf16.mxu0 %v4111_v30  ;;  %1302 = vmatprep.subr.bf16.mxu1 %v4113_v31  ;;  %v4087_v54 = vcombine.high %v495_v48, %v499_v49  ;;  %v476_v55 = vld [vmem:[%s5569_s29 + $0x8] sm:$0xff]  ;;  %v4089_v56 = vcombine.high %v496_v50, %v500_v51  ;;  %v487_v57 = vld [vmem:[%s5576_s0] sm:$0xff]  ;;  %v4086_v62 = vcombine.low %v495_v48, %v499_v49 }
  0xaf   : > { %v491_v58 = vld [vmem:[%s5576_s0 + $0x20] sm:$0xff]  ;;  %v5623_v59 = vpack.c.bf16 %v476_v55, %v476_v55  ;;  %v488_v60 = vld [vmem:[%s5576_s0 + $0x8] sm:$0xff]  ;;  %v4088_v63 = vcombine.low %v496_v50, %v500_v51 }
  0xb0   : > { %v492_v61 = vld [vmem:[%s5576_s0 + $0x28] sm:$0xff]  ;;  %v4079_v0 = vcombine.high %v487_v57, %v491_v58  ;;  %v607_v2 = vld [vmem:[%s5576_s0 + $0x3c0] sm:$0xff]  ;;  %v4078_v6 = vcombine.low %v487_v57, %v491_v58 }
  0xb1   : > { %1262 = vmatpush1.bf16.msra.mxu0 %v4110_v36  ;;  %1303 = vmatpush1.bf16.msra.mxu1 %v4112_v37  ;;  %v4081_v1 = vcombine.high %v488_v60, %v492_v61  ;;  %v611_v3 = vld [vmem:[%s5576_s0 + $0x3e0] sm:$0xff]  ;;  %v608_v4 = vld [vmem:[%s5576_s0 + $0x3c8] sm:$0xff]  ;;  %v4080_v7 = vcombine.low %v488_v60, %v492_v61 }
  0xb2   : > { %1263 = vmatprep.subr.bf16.mxu0 %v4103_v38  ;;  %1304 = vmatprep.subr.bf16.mxu1 %v4105_v39  ;;  %v612_v5 = vld [vmem:[%s5576_s0 + $0x3e8] sm:$0xff]  ;;  %v4199_v8 = vcombine.high %v607_v2, %v611_v3  ;;  %v599_v10 = vld [vmem:[%s5576_s0 + $0x380] sm:$0xff]  ;;  %v4198_v14 = vcombine.low %v607_v2, %v611_v3  ;;  %v545_v3 = vld [vmem:[%s5576_s0 + $0x1d0] sm:$0xff] }
  0xb3   : > { %1287 = vmatprep.mubr.bf16.mxu0 %v5623_v59  ;;  %1328 = vmatprep.mubr.bf16.mxu1 %v5623_v59  ;;  %v4201_v9 = vcombine.high %v608_v4, %v612_v5  ;;  %v603_v11 = vld [vmem:[%s5576_s0 + $0x3a0] sm:$0xff]  ;;  %v600_v12 = vld [vmem:[%s5576_s0 + $0x388] sm:$0xff]  ;;  %v4200_v15 = vcombine.low %v608_v4, %v612_v5  ;;  %v549_v4 = vld [vmem:[%s5576_s0 + $0x1f0] sm:$0xff] }
  0xb4   : > { %v604_v13 = vld [vmem:[%s5576_s0 + $0x3a8] sm:$0xff]  ;;  %v4191_v16 = vcombine.high %v599_v10, %v603_v11  ;;  %v591_v18 = vld [vmem:[%s5576_s0 + $0x340] sm:$0xff]  ;;  %v4190_v22 = vcombine.low %v599_v10, %v603_v11  ;;  %v546_v5 = vld [vmem:[%s5576_s0 + $0x1d8] sm:$0xff]  ;;  %v4139_v10 = vcombine.high %v545_v3, %v549_v4 }
  0xb5   : > { %1264 = vmatpush1.bf16.msra.mxu0 %v4102_v44  ;;  %1305 = vmatpush1.bf16.msra.mxu1 %v4104_v45  ;;  %v4193_v17 = vcombine.high %v600_v12, %v604_v13  ;;  %v595_v19 = vld [vmem:[%s5576_s0 + $0x360] sm:$0xff]  ;;  %v592_v20 = vld [vmem:[%s5576_s0 + $0x348] sm:$0xff]  ;;  %v4192_v23 = vcombine.low %v600_v12, %v604_v13  ;;  %v537_v12 = vld [vmem:[%s5576_s0 + $0x190] sm:$0xff] }
  0xb6   : > { %1265 = vmatprep.subr.bf16.mxu0 %v4095_v46  ;;  %1306 = vmatprep.subr.bf16.mxu1 %v4097_v47  ;;  %v596_v21 = vld [vmem:[%s5576_s0 + $0x368] sm:$0xff]  ;;  %v4183_v24 = vcombine.high %v591_v18, %v595_v19  ;;  %v583_v26 = vld [vmem:[%s5576_s0 + $0x300] sm:$0xff]  ;;  %v4182_v30 = vcombine.low %v591_v18, %v595_v19  ;;  %v541_v13 = vld [vmem:[%s5576_s0 + $0x1b0] sm:$0xff] }
  0xb7   : > { %v4185_v25 = vcombine.high %v592_v20, %v596_v21  ;;  %v587_v27 = vld [vmem:[%s5576_s0 + $0x320] sm:$0xff]  ;;  %v584_v28 = vld [vmem:[%s5576_s0 + $0x308] sm:$0xff]  ;;  %v4184_v31 = vcombine.low %v592_v20, %v596_v21  ;;  %v4131_v19 = vcombine.high %v537_v12, %v541_v13  ;;  %v529_v21 = vld [vmem:[%s5576_s0 + $0x150] sm:$0xff] }
  0xb8   : > { %v588_v29 = vld [vmem:[%s5576_s0 + $0x328] sm:$0xff]  ;;  %v4175_v32 = vcombine.high %v583_v26, %v587_v27  ;;  %v575_v34 = vld [vmem:[%s5576_s0 + $0x2c0] sm:$0xff]  ;;  %v4174_v38 = vcombine.low %v583_v26, %v587_v27 }
  0xb9   : > { %1266 = vmatpush1.bf16.msra.mxu0 %v4094_v52  ;;  %1307 = vmatpush1.bf16.msra.mxu1 %v4096_v53  ;;  %v4177_v33 = vcombine.high %v584_v28, %v588_v29  ;;  %v579_v35 = vld [vmem:[%s5576_s0 + $0x2e0] sm:$0xff]  ;;  %v576_v36 = vld [vmem:[%s5576_s0 + $0x2c8] sm:$0xff]  ;;  %v4176_v39 = vcombine.low %v584_v28, %v588_v29  ;;  %v521_v29 = vld [vmem:[%s5576_s0 + $0x110] sm:$0xff] }
  0xba   : > { %1267 = vmatprep.subr.bf16.mxu0 %v4087_v54  ;;  %1308 = vmatprep.subr.bf16.mxu1 %v4089_v56  ;;  %v580_v37 = vld [vmem:[%s5576_s0 + $0x2e8] sm:$0xff]  ;;  %v4167_v40 = vcombine.high %v575_v34, %v579_v35  ;;  %v567_v42 = vld [vmem:[%s5576_s0 + $0x280] sm:$0xff]  ;;  %v4166_v46 = vcombine.low %v575_v34, %v579_v35 }
  0xbb   : > { %v4169_v41 = vcombine.high %v576_v36, %v580_v37  ;;  %v571_v43 = vld [vmem:[%s5576_s0 + $0x2a0] sm:$0xff]  ;;  %v568_v44 = vld [vmem:[%s5576_s0 + $0x288] sm:$0xff]  ;;  %v4168_v47 = vcombine.low %v576_v36, %v580_v37  ;;  %v513_v37 = vld [vmem:[%s5576_s0 + $0xd0] sm:$0xff] }
  0xbc   : > { %v572_v45 = vld [vmem:[%s5576_s0 + $0x2a8] sm:$0xff]  ;;  %v4159_v48 = vcombine.high %v567_v42, %v571_v43  ;;  %v559_v50 = vld [vmem:[%s5576_s0 + $0x240] sm:$0xff]  ;;  %v4158_v54 = vcombine.low %v567_v42, %v571_v43 }
  0xbd   : > { %1268 = vmatpush1.bf16.msra.mxu0 %v4086_v62  ;;  %1309 = vmatpush1.bf16.msra.mxu1 %v4088_v63  ;;  %v4161_v49 = vcombine.high %v568_v44, %v572_v45  ;;  %v563_v51 = vld [vmem:[%s5576_s0 + $0x260] sm:$0xff]  ;;  %v560_v52 = vld [vmem:[%s5576_s0 + $0x248] sm:$0xff]  ;;  %v4160_v55 = vcombine.low %v568_v44, %v572_v45  ;;  %v505_v44 = vld [vmem:[%s5576_s0 + $0x90] sm:$0xff] }
  0xbe   : > { %1269 = vmatprep.subr.bf16.mxu0 %v4079_v0  ;;  %1310 = vmatprep.subr.bf16.mxu1 %v4081_v1  ;;  %v564_v53 = vld [vmem:[%s5576_s0 + $0x268] sm:$0xff]  ;;  %v4151_v56 = vcombine.high %v559_v50, %v563_v51  ;;  %v551_v58 = vld [vmem:[%s5576_s0 + $0x200] sm:$0xff]  ;;  %v4150_v63 = vcombine.low %v559_v50, %v563_v51  ;;  %v509_v45 = vld [vmem:[%s5576_s0 + $0xb0] sm:$0xff] }
  0xbf   : > { %v4153_v57 = vcombine.high %v560_v52, %v564_v53  ;;  %v555_v60 = vld [vmem:[%s5576_s0 + $0x220] sm:$0xff]  ;;  %v552_v61 = vld [vmem:[%s5576_s0 + $0x208] sm:$0xff]  ;;  %v4152_v0 = vcombine.low %v560_v52, %v564_v53  ;;  %v4099_v50 = vcombine.high %v505_v44, %v509_v45  ;;  %v497_v52 = vld [vmem:[%s5576_s0 + $0x50] sm:$0xff] }
  0xc0   : > { %v556_v62 = vld [vmem:[%s5576_s0 + $0x228] sm:$0xff]  ;;  %v4143_v1 = vcombine.high %v551_v58, %v555_v60  ;;  %v501_v53 = vld [vmem:[%s5576_s0 + $0x70] sm:$0xff] }
  0xc1   : > { %1270 = vmatpush1.bf16.msra.mxu0 %v4078_v6  ;;  %1311 = vmatpush1.bf16.msra.mxu1 %v4080_v7  ;;  %v4145_v2 = vcombine.high %v552_v61, %v556_v62  ;;  %v550_v6 = vld [vmem:[%s5576_s0 + $0x1f8] sm:$0xff]  ;;  %v4142_v7 = vcombine.low %v551_v58, %v555_v60  ;;  %v4091_v58 = vcombine.high %v497_v52, %v501_v53 }
  0xc2   : > { %1271 = vmatprep.subr.bf16.mxu0 %v4199_v8  ;;  %1312 = vmatprep.subr.bf16.mxu1 %v4201_v9  ;;  %v475_v8 = vld [vmem:[%s5569_s29] sm:$0xff]  ;;  %v4144_v9 = vcombine.low %v552_v61, %v556_v62  ;;  %v4141_v11 = vcombine.high %v546_v5, %v550_v6  ;;  %v4140_v18 = vcombine.low %v546_v5, %v550_v6 }
  0xc3   : > { %v489_v61 = vld [vmem:[%s5576_s0 + $0x10] sm:$0xff] }
  0xc4   : > { %v493_v62 = vld [vmem:[%s5576_s0 + $0x30] sm:$0xff] }
  0xc5   : > { %1272 = vmatpush2.bf16.msra.mxu0 %v4198_v14  ;;  %1313 = vmatpush2.bf16.msra.mxu1 %v4200_v15  ;;  %v5668_v14 = vpack.c.bf16 %v475_v8, %v475_v8  ;;  %v538_v15 = vld [vmem:[%s5576_s0 + $0x198] sm:$0xff]  ;;  %v609_v5 = vld [vmem:[%s5576_s0 + $0x3d0] sm:$0xff] }
  0xc6   : > { %1273 = vmatprep.subr.bf16.mxu0 %v4191_v16  ;;  %1314 = vmatprep.subr.bf16.mxu1 %v4193_v17  ;;  %v542_v16 = vld [vmem:[%s5576_s0 + $0x1b8] sm:$0xff]  ;;  %v4138_v17 = vcombine.low %v545_v3, %v549_v4  ;;  %v4083_v3 = vcombine.high %v489_v61, %v493_v62  ;;  %v613_v6 = vld [vmem:[%s5576_s0 + $0x3f0] sm:$0xff] }
  0xc7   : > { %v4133_v20 = vcombine.high %v538_v15, %v542_v16  ;;  %v4132_v26 = vcombine.low %v538_v15, %v542_v16  ;;  %v614_v8 = vld [vmem:[%s5576_s0 + $0x3f8] sm:$0xff]  ;;  %v605_v15 = vld [vmem:[%s5576_s0 + $0x3b0] sm:$0xff] }
  0xc8   : > { %v602_v16 = vld [vmem:[%s5576_s0 + $0x398] sm:$0xff] }
  0xc9   : > { %1274 = vmatpush2.bf16.msra.mxu0 %v4190_v22  ;;  %1315 = vmatpush2.bf16.msra.mxu1 %v4192_v23  ;;  %v533_v22 = vld [vmem:[%s5576_s0 + $0x170] sm:$0xff]  ;;  %v530_v23 = vld [vmem:[%s5576_s0 + $0x158] sm:$0xff] }
  0xca   : > { %1275 = vmatprep.subr.bf16.mxu0 %v4183_v24  ;;  %1316 = vmatprep.subr.bf16.mxu1 %v4185_v25  ;;  %v534_v24 = vld [vmem:[%s5576_s0 + $0x178] sm:$0xff]  ;;  %v4130_v25 = vcombine.low %v537_v12, %v541_v13  ;;  %v4123_v27 = vcombine.high %v529_v21, %v533_v22  ;;  %v601_v13 = vld [vmem:[%s5576_s0 + $0x390] sm:$0xff] }
  0xcb   : > { %v4125_v28 = vcombine.high %v530_v23, %v534_v24  ;;  %v4124_v34 = vcombine.low %v530_v23, %v534_v24  ;;  %v597_v23 = vld [vmem:[%s5576_s0 + $0x370] sm:$0xff]  ;;  %v594_v24 = vld [vmem:[%s5576_s0 + $0x358] sm:$0xff] }
  0xcd   : > { %1276 = vmatpush2.bf16.msra.mxu0 %v4182_v30  ;;  %1317 = vmatpush2.bf16.msra.mxu1 %v4184_v31  ;;  %v525_v30 = vld [vmem:[%s5576_s0 + $0x130] sm:$0xff]  ;;  %v522_v31 = vld [vmem:[%s5576_s0 + $0x118] sm:$0xff] }
  0xce   : > { %1277 = vmatprep.subr.bf16.mxu0 %v4175_v32  ;;  %1318 = vmatprep.subr.bf16.mxu1 %v4177_v33  ;;  %v526_v32 = vld [vmem:[%s5576_s0 + $0x138] sm:$0xff]  ;;  %v4122_v33 = vcombine.low %v529_v21, %v533_v22  ;;  %v4115_v35 = vcombine.high %v521_v29, %v525_v30  ;;  %v593_v22 = vld [vmem:[%s5576_s0 + $0x350] sm:$0xff] }
  0xcf   : > { %v4117_v36 = vcombine.high %v522_v31, %v526_v32 }
  0xd1   : > { %1278 = vmatpush2.bf16.msra.mxu0 %v4174_v38  ;;  %1319 = vmatpush2.bf16.msra.mxu1 %v4176_v39  ;;  %v517_v38 = vld [vmem:[%s5576_s0 + $0xf0] sm:$0xff]  ;;  %v514_v39 = vld [vmem:[%s5576_s0 + $0xd8] sm:$0xff] }
  0xd2   : > { %1279 = vmatprep.subr.bf16.mxu0 %v4167_v40  ;;  %1320 = vmatprep.subr.bf16.mxu1 %v4169_v41  ;;  %v518_v40 = vld [vmem:[%s5576_s0 + $0xf8] sm:$0xff]  ;;  %v4114_v41 = vcombine.low %v521_v29, %v525_v30  ;;  %v4107_v42 = vcombine.high %v513_v37, %v517_v38  ;;  %v585_v30 = vld [vmem:[%s5576_s0 + $0x310] sm:$0xff] }
  0xd3   : > { %v4109_v43 = vcombine.high %v514_v39, %v518_v40 }
  0xd5   : > { %1280 = vmatpush2.bf16.msra.mxu0 %v4166_v46  ;;  %1321 = vmatpush2.bf16.msra.mxu1 %v4168_v47  ;;  %v506_v46 = vld [vmem:[%s5576_s0 + $0x98] sm:$0xff] }
  0xd6   : > { %1281 = vmatprep.subr.bf16.mxu0 %v4159_v48  ;;  %1322 = vmatprep.subr.bf16.mxu1 %v4161_v49  ;;  %v510_v47 = vld [vmem:[%s5576_s0 + $0xb8] sm:$0xff]  ;;  %v4106_v48 = vcombine.low %v513_v37, %v517_v38  ;;  %v4108_v49 = vcombine.low %v514_v39, %v518_v40  ;;  %v577_v38 = vld [vmem:[%s5576_s0 + $0x2d0] sm:$0xff] }
  0xd7   : > { %v4101_v51 = vcombine.high %v506_v46, %v510_v47  ;;  %v581_v39 = vld [vmem:[%s5576_s0 + $0x2f0] sm:$0xff]  ;;  %v578_v40 = vld [vmem:[%s5576_s0 + $0x2d8] sm:$0xff] }
  0xd9   : > { %1282 = vmatpush2.bf16.msra.mxu0 %v4158_v54  ;;  %1323 = vmatpush2.bf16.msra.mxu1 %v4160_v55  ;;  %v498_v54 = vld [vmem:[%s5576_s0 + $0x58] sm:$0xff] }
  0xda   : > { %1283 = vmatprep.subr.bf16.mxu0 %v4151_v56  ;;  %1324 = vmatprep.subr.bf16.mxu1 %v4153_v57  ;;  %v502_v55 = vld [vmem:[%s5576_s0 + $0x78] sm:$0xff]  ;;  %v4098_v56 = vcombine.low %v505_v44, %v509_v45  ;;  %v4100_v57 = vcombine.low %v506_v46, %v510_v47  ;;  %v569_v45 = vld [vmem:[%s5576_s0 + $0x290] sm:$0xff] }
  0xdb   : > { %v4093_v60 = vcombine.high %v498_v54, %v502_v55  ;;  %v573_v46 = vld [vmem:[%s5576_s0 + $0x2b0] sm:$0xff]  ;;  %v570_v47 = vld [vmem:[%s5576_s0 + $0x298] sm:$0xff] }
  0xdd   : > { %1284 = vmatpush2.bf16.msra.mxu0 %v4150_v63  ;;  %1325 = vmatpush2.bf16.msra.mxu1 %v4152_v0  ;;  %v490_v63 = vld [vmem:[%s5576_s0 + $0x18] sm:$0xff] }
  0xde   : > { %1285 = vmatprep.subr.bf16.mxu0 %v4143_v1  ;;  %1326 = vmatprep.subr.bf16.mxu1 %v4145_v2  ;;  %v494_v0 = vld [vmem:[%s5576_s0 + $0x38] sm:$0xff]  ;;  %v4090_v1 = vcombine.low %v497_v52, %v501_v53  ;;  %v4092_v2 = vcombine.low %v498_v54, %v502_v55  ;;  %v561_v53 = vld [vmem:[%s5576_s0 + $0x250] sm:$0xff] }
  0xdf   : > { %v4085_v4 = vcombine.high %v490_v63, %v494_v0  ;;  %v565_v54 = vld [vmem:[%s5576_s0 + $0x270] sm:$0xff]  ;;  %v562_v55 = vld [vmem:[%s5576_s0 + $0x258] sm:$0xff] }
  0xe1   : > { %1286 = vmatpush2.bf16.msra.mxu0 %v4142_v7  ;;  %1327 = vmatpush2.bf16.msra.mxu1 %v4144_v9  ;;  %v610_v7 = vld [vmem:[%s5576_s0 + $0x3d8] sm:$0xff]  ;;  %v4082_v9 = vcombine.low %v489_v61, %v493_v62  ;;  %v553_v62 = vld [vmem:[%s5576_s0 + $0x210] sm:$0xff] }
  0xe2   : > { %1337 = vmatprep.subr.bf16.mxu0 %v4139_v10  ;;  %1378 = vmatprep.subr.bf16.mxu1 %v4141_v11  ;;  %v4084_v10 = vcombine.low %v490_v63, %v494_v0  ;;  %v4203_v11 = vcombine.high %v609_v5, %v613_v6  ;;  %v4205_v12 = vcombine.high %v610_v7, %v614_v8  ;;  %v557_v63 = vld [vmem:[%s5576_s0 + $0x230] sm:$0xff]  ;;  %v554_v0 = vld [vmem:[%s5576_s0 + $0x218] sm:$0xff] }
  0xe4   : > { %1288 = vmatmul.mubr.bf16.vlgmr.msra.gmra.mxu0 %v5668_v14  ;;  %1329 = vmatmul.mubr.bf16.vlgmr.msra.gmra.mxu1 %v5668_v14 }
  0xe5   : > { %1338 = vmatpush1.bf16.msra.mxu0 %v4138_v17  ;;  %1379 = vmatpush1.bf16.msra.mxu1 %v4140_v18  ;;  %v606_v17 = vld [vmem:[%s5576_s0 + $0x3b8] sm:$0xff]  ;;  %v4202_v18 = vcombine.low %v609_v5, %v613_v6  ;;  %v4146_v6 = vcombine.low %v553_v62, %v557_v63 }
  0xe6   : > { %1339 = vmatprep.subr.bf16.mxu0 %v4131_v19  ;;  %1380 = vmatprep.subr.bf16.mxu1 %v4133_v20  ;;  %v4204_v19 = vcombine.low %v610_v7, %v614_v8  ;;  %v4195_v20 = vcombine.high %v601_v13, %v605_v15  ;;  %v4197_v21 = vcombine.high %v602_v16, %v606_v17  ;;  %v479_v8 = vld [vmem:[#allocation2 + $0x30] sm:$0xff] }
  0xe7   : > { %1369 = vmatprep.mubr.bf16.mxu0 %v5623_v59  ;;  %1410 = vmatprep.mubr.bf16.mxu1 %v5623_v59  ;;  %v4116_v59 = vcombine.low %v522_v31, %v526_v32  ;;  %v589_v31 = vld [vmem:[%s5576_s0 + $0x330] sm:$0xff]  ;;  %v586_v32 = vld [vmem:[%s5576_s0 + $0x318] sm:$0xff] }
  0xe9   : > { %1340 = vmatpush1.bf16.msra.mxu0 %v4130_v25  ;;  %1381 = vmatpush1.bf16.msra.mxu1 %v4132_v26  ;;  %v598_v25 = vld [vmem:[%s5576_s0 + $0x378] sm:$0xff]  ;;  %v4194_v26 = vcombine.low %v601_v13, %v605_v15  ;;  %v482_v15 = vld [vmem:[#allocation2 + $0x10] sm:$0xff] }
  0xea   : > { %1341 = vmatprep.subr.bf16.mxu0 %v4123_v27  ;;  %1382 = vmatprep.subr.bf16.mxu1 %v4125_v28  ;;  %v4196_v27 = vcombine.low %v602_v16, %v606_v17  ;;  %v4187_v28 = vcombine.high %v593_v22, %v597_v23  ;;  %v4189_v29 = vcombine.high %v594_v24, %v598_v25 }
  0xed   : > { %1342 = vmatpush1.bf16.msra.mxu0 %v4122_v33  ;;  %1383 = vmatpush1.bf16.msra.mxu1 %v4124_v34  ;;  %v590_v33 = vld [vmem:[%s5576_s0 + $0x338] sm:$0xff]  ;;  %v4186_v34 = vcombine.low %v593_v22, %v597_v23 }
  0xee   : > { %1343 = vmatprep.subr.bf16.mxu0 %v4115_v35  ;;  %1384 = vmatprep.subr.bf16.mxu1 %v4117_v36  ;;  %v4188_v35 = vcombine.low %v594_v24, %v598_v25  ;;  %v4179_v36 = vcombine.high %v585_v30, %v589_v31  ;;  %v4181_v37 = vcombine.high %v586_v32, %v590_v33  ;;  %v483_v24 = vld [vmem:[#allocation2 + $0x8] sm:$0xff] }
  0xef   : > { %v485_v25 = vld [vmem:[#allocation2 + $0x28] sm:$0xff] }
  0xf1   : > { %1344 = vmatpush1.bf16.msra.mxu0 %v4114_v41  ;;  %1385 = vmatpush1.bf16.msra.mxu1 %v4116_v59  ;;  %v582_v41 = vld [vmem:[%s5576_s0 + $0x2f8] sm:$0xff]  ;;  %v4178_v59 = vcombine.low %v585_v30, %v589_v31 }
  0xf2   : > { %1345 = vmatprep.subr.bf16.mxu0 %v4107_v42  ;;  %1386 = vmatprep.subr.bf16.mxu1 %v4109_v43  ;;  %v4180_v42 = vcombine.low %v586_v32, %v590_v33  ;;  %v4171_v43 = vcombine.high %v577_v38, %v581_v39  ;;  %v4173_v44 = vcombine.high %v578_v40, %v582_v41  ;;  %v486_v30 = vld [vmem:[#allocation2 + $0x38] sm:$0xff] }
  0xf5   : > { %1346 = vmatpush1.bf16.msra.mxu0 %v4106_v48  ;;  %1387 = vmatpush1.bf16.msra.mxu1 %v4108_v49  ;;  %v574_v48 = vld [vmem:[%s5576_s0 + $0x2b8] sm:$0xff]  ;;  %v4170_v49 = vcombine.low %v577_v38, %v581_v39 }
  0xf6   : > { %1347 = vmatprep.subr.bf16.mxu0 %v4099_v50  ;;  %1388 = vmatprep.subr.bf16.mxu1 %v4101_v51  ;;  %v4172_v50 = vcombine.low %v578_v40, %v582_v41  ;;  %v4163_v51 = vcombine.high %v569_v45, %v573_v46  ;;  %v4165_v52 = vcombine.high %v570_v47, %v574_v48 }
  0xf9   : > { %1348 = vmatpush1.bf16.msra.mxu0 %v4098_v56  ;;  %1389 = vmatpush1.bf16.msra.mxu1 %v4100_v57  ;;  %v566_v56 = vld [vmem:[%s5576_s0 + $0x278] sm:$0xff]  ;;  %v4162_v57 = vcombine.low %v569_v45, %v573_v46 }
  0xfa   : > { %1349 = vmatprep.subr.bf16.mxu0 %v4091_v58  ;;  %1390 = vmatprep.subr.bf16.mxu1 %v4093_v60  ;;  %v4164_v58 = vcombine.low %v570_v47, %v574_v48  ;;  %v4155_v60 = vcombine.high %v561_v53, %v565_v54  ;;  %v4157_v61 = vcombine.high %v562_v55, %v566_v56 }
  0xfd   : > { %1350 = vmatpush1.bf16.msra.mxu0 %v4090_v1  ;;  %1391 = vmatpush1.bf16.msra.mxu1 %v4092_v2  ;;  %v558_v1 = vld [vmem:[%s5576_s0 + $0x238] sm:$0xff]  ;;  %v4154_v2 = vcombine.low %v561_v53, %v565_v54 }
  0xfe   : > { %1351 = vmatprep.subr.bf16.mxu0 %v4083_v3  ;;  %1392 = vmatprep.subr.bf16.mxu1 %v4085_v4  ;;  %v4156_v3 = vcombine.low %v562_v55, %v566_v56  ;;  %v4147_v4 = vcombine.high %v553_v62, %v557_v63  ;;  %v4149_v5 = vcombine.high %v554_v0, %v558_v1 }
  0xff   : > { %v4148_v7 = vcombine.low %v554_v0, %v558_v1 }
 0x101   : > { %1352 = vmatpush1.bf16.msra.mxu0 %v4082_v9  ;;  %1393 = vmatpush1.bf16.msra.mxu1 %v4084_v10  ;;  %v481_v9 = vld [vmem:[#allocation2 + $0x18] sm:$0xff] }
 0x102   : > { %1353 = vmatprep.subr.bf16.mxu0 %v4203_v11  ;;  %1394 = vmatprep.subr.bf16.mxu1 %v4205_v12  ;;  %v480_v11 = vld [vmem:[#allocation2] sm:$0xff] }
 0x105   : > { %1354 = vmatpush2.bf16.msra.mxu0 %v4202_v18  ;;  %1395 = vmatpush2.bf16.msra.mxu1 %v4204_v19 }
 0x106   : > { %1355 = vmatprep.subr.bf16.mxu0 %v4195_v20  ;;  %1396 = vmatprep.subr.bf16.mxu1 %v4197_v21 }
 0x109   : > { %1356 = vmatpush2.bf16.msra.mxu0 %v4194_v26  ;;  %1397 = vmatpush2.bf16.msra.mxu1 %v4196_v27  ;;  %v484_v27 = vld [vmem:[#allocation2 + $0x20] sm:$0xff] }
 0x10a   : > { %1357 = vmatprep.subr.bf16.mxu0 %v4187_v28  ;;  %1398 = vmatprep.subr.bf16.mxu1 %v4189_v29 }
 0x10d   : > { %1358 = vmatpush2.bf16.msra.mxu0 %v4186_v34  ;;  %1399 = vmatpush2.bf16.msra.mxu1 %v4188_v35 }
 0x10e   : > { %1359 = vmatprep.subr.bf16.mxu0 %v4179_v36  ;;  %1400 = vmatprep.subr.bf16.mxu1 %v4181_v37 }
 0x111   : > { %1360 = vmatpush2.bf16.msra.mxu0 %v4178_v59  ;;  %1401 = vmatpush2.bf16.msra.mxu1 %v4180_v42 }
 0x112   : > { %1361 = vmatprep.subr.bf16.mxu0 %v4171_v43  ;;  %1402 = vmatprep.subr.bf16.mxu1 %v4173_v44 }
 0x115   : > { %1362 = vmatpush2.bf16.msra.mxu0 %v4170_v49  ;;  %1403 = vmatpush2.bf16.msra.mxu1 %v4172_v50 }
 0x116   : > { %1363 = vmatprep.subr.bf16.mxu0 %v4163_v51  ;;  %1404 = vmatprep.subr.bf16.mxu1 %v4165_v52 }
 0x119   : > { %1364 = vmatpush2.bf16.msra.mxu0 %v4162_v57  ;;  %1405 = vmatpush2.bf16.msra.mxu1 %v4164_v58 }
 0x11a   : > { %1365 = vmatprep.subr.bf16.mxu0 %v4155_v60  ;;  %1406 = vmatprep.subr.bf16.mxu1 %v4157_v61 }
 0x11d   : > { %1366 = vmatpush2.bf16.msra.mxu0 %v4154_v2  ;;  %1407 = vmatpush2.bf16.msra.mxu1 %v4156_v3 }
 0x11e   : > { %1367 = vmatprep.subr.bf16.mxu0 %v4147_v4  ;;  %1408 = vmatprep.subr.bf16.mxu1 %v4149_v5 }
 0x121   : > { %1368 = vmatpush2.bf16.msra.mxu0 %v4146_v6  ;;  %1409 = vmatpush2.bf16.msra.mxu1 %v4148_v7 }
 0x124   : > { %1370 = vmatmul.mubr.bf16.vlgmr.msra.gmra.mxu0 %v5668_v14  ;;  %1411 = vmatmul.mubr.bf16.vlgmr.msra.gmra.mxu1 %v5668_v14 }
 0x1a4   : > { %v1289_v10 = vpop.f32.mrf.mxu0  ;;  %v1330_v13 = vpop.f32.mrf.mxu1 }
 0x1a5   : > { %v1419_v12 = vadd.f32 %v1289_v10, %v479_v8  ;;  %v1421_v16 = vadd.f32 %v1330_v13, %v481_v9 }
 0x1a6   : > { %v1291_v17 = vpop.f32.mrf.mxu0  ;;  %v1332_v19 = vpop.f32.mrf.mxu1 }
 0x1a7   : > { %1427 = vst [vmem:[#allocation2 + $0x30] sm:$0xff] %v1419_v12  ;;  %v1420_v18 = vadd.f32 %v1291_v17, %v480_v11  ;;  %1429 = vst [vmem:[#allocation2 + $0x18] sm:$0xff] %v1421_v16  ;;  %v1422_v20 = vadd.f32 %v1332_v19, %v482_v15 }
 0x1a8   : > { %v1293_v21 = vpop.f32.mrf.mxu0  ;;  %v1334_v22 = vpop.f32.mrf.mxu1 }
 0x1a9   : > { %1428 = vst [vmem:[#allocation2] sm:$0xff] %v1420_v18  ;;  %1430 = vst [vmem:[#allocation2 + $0x10] sm:$0xff] %v1422_v20 }
 0x1aa   : > { %v1294_v23 = vpop.f32.mrf.mxu0  ;;  %v1335_v14 = vpop.f32.mrf.mxu1 }
 0x1e4   : > { %v1371_v26 = vpop.f32.mrf.mxu0  ;;  %v1412_v29 = vpop.f32.mrf.mxu1 }
 0x1e5   : > { %v1423_v28 = vadd.f32 %v1371_v26, %v483_v24  ;;  %v1425_v31 = vadd.f32 %v1412_v29, %v485_v25 }
 0x1e6   : > { %v1373_v32 = vpop.f32.mrf.mxu0  ;;  %v1414_v34 = vpop.f32.mrf.mxu1  ;;  %1438 = sbr.rel (%p4206_p11) target bundleno = 1330 (0x532), region = 92 }
 0x1e7   : > { %1431 = vst [vmem:[#allocation2 + $0x8] sm:$0xff] %v1423_v28  ;;  %v1424_v33 = vadd.f32 %v1373_v32, %v484_v27  ;;  %1433 = vst [vmem:[#allocation2 + $0x28] sm:$0xff] %v1425_v31  ;;  %v1426_v35 = vadd.f32 %v1414_v34, %v486_v30 }
 0x1e8   : > { %v1375_v36 = vpop.f32.mrf.mxu0  ;;  %v1416_v37 = vpop.f32.mrf.mxu1 }
 0x1e9   : > { %1432 = vst [vmem:[#allocation2 + $0x20] sm:$0xff] %v1424_v33  ;;  %1434 = vst [vmem:[#allocation2 + $0x38] sm:$0xff] %v1426_v35 }
 0x1ea   : > { %v1376_v38 = vpop.f32.mrf.mxu0  ;;  %v1417_v39 = vpop.f32.mrf.mxu1 }
 0x1eb   : > { %v4628_v40 = vld [vmem:[#allocation11 + $0xe4] ss:$16 sps:$4 sm:$0xff]   ;;  %v4632_v59 = vld [vmem:[#allocation11 + $0xe0] ss:$16 sps:$4 sm:$0xff]   ;;  %v1452_v13 = vlaneseq  ;;  %v5742_v29 = vld [vmem:[#allocation10] sm:$0xff]  ;;  %v5754_v39 = vstv %s1439_s20  ;;  %vm3952_vm14 = vcmask 7168  }
 0x1ec   : > { %v4630_v41 = vld [vmem:[#allocation11 + $0x2e4] ss:$16 sps:$4 sm:$0xff]   ;;  %3091 = vmatprep.subr.bf16.mxu0 %v4628_v40  ;;  %v4633_v42 = vld [vmem:[#allocation11 + $0x2e0] ss:$16 sps:$4 sm:$0xff]  }
 0x1ed   : > { %3132 = vmatprep.subr.bf16.mxu1 %v4630_v41  ;;  %v4634_v43 = vld [vmem:[#allocation11 + $0xc4] ss:$16 sps:$4 sm:$0xff]   ;;  %3092 = vmatpush1.bf16.msra.mxu0 %v4632_v59  ;;  %v4638_v45 = vld [vmem:[#allocation11 + $0xc0] ss:$16 sps:$4 sm:$0xff]   ;;  %v5735_v19 = vshrl.u32 %v1452_v13, 7 }
 0x1ee   : > { %3133 = vmatpush1.bf16.msra.mxu1 %v4633_v42  ;;  %v4636_v44 = vld [vmem:[#allocation11 + $0x2c4] ss:$16 sps:$4 sm:$0xff]   ;;  %3093 = vmatprep.subr.bf16.mxu0 %v4634_v43  ;;  %v4639_v46 = vld [vmem:[#allocation11 + $0x2c0] ss:$16 sps:$4 sm:$0xff]  }
 0x1ef   : > { %3134 = vmatprep.subr.bf16.mxu1 %v4636_v44  ;;  %v4640_v47 = vld [vmem:[#allocation11 + $0xa4] ss:$16 sps:$4 sm:$0xff]   ;;  %v4644_v49 = vld [vmem:[#allocation11 + $0xa0] ss:$16 sps:$4 sm:$0xff]   ;;  %v5738_v14 = vsub.s32 1, %v5735_v19  ;;  %v1466_v24 = vsub.s32 3, %v5735_v19 }
 0x1f0   : > { %v4642_v48 = vld [vmem:[#allocation11 + $0x2a4] ss:$16 sps:$4 sm:$0xff]   ;;  %v4645_v50 = vld [vmem:[#allocation11 + $0x2a0] ss:$16 sps:$4 sm:$0xff]   ;;  %v1470_v27 = vsub.s32 4, %v5735_v19  ;;  %v5745_v31 = vsub.s32 0, %v5735_v19 }
 0x1f1   : > { %3094 = vmatpush1.bf16.msra.mxu0 %v4638_v45  ;;  %v4646_v51 = vld [vmem:[#allocation11 + $0x84] ss:$16 sps:$4 sm:$0xff]   ;;  %v4650_v53 = vld [vmem:[#allocation11 + $0x80] ss:$16 sps:$4 sm:$0xff]   ;;  %v1462_v32 = vsub.s32 2, %v5735_v19  ;;  %v1478_v33 = vsub.s32 6, %v5735_v19  ;;  %v1459_v35 = vrot.slane %v5742_v29, %v5738_v14  ;;  %v1467_v36 = vrot.slane %v5742_v29, %v1466_v24 }
 0x1f2   : > { %3135 = vmatpush1.bf16.msra.mxu1 %v4639_v46  ;;  %3095 = vmatprep.subr.bf16.mxu0 %v4640_v47  ;;  %v4648_v52 = vld [vmem:[#allocation11 + $0x284] ss:$16 sps:$4 sm:$0xff]   ;;  %v4651_v54 = vld [vmem:[#allocation11 + $0x280] ss:$16 sps:$4 sm:$0xff]   ;;  %v5757_v42 = vrot.slane %v5742_v29, %v1470_v27  ;;  %v1455_v44 = vrot.slane %v5742_v29, %v5745_v31 }
 0x1f3   : > { %3136 = vmatprep.subr.bf16.mxu1 %v4642_v48  ;;  %v4652_v55 = vld [vmem:[#allocation11 + $0x64] ss:$16 sps:$4 sm:$0xff]   ;;  %v4656_v57 = vld [vmem:[#allocation11 + $0x60] ss:$16 sps:$4 sm:$0xff]   ;;  %v1463_v45 = vrot.slane %v5742_v29, %v1462_v32  ;;  %v5765_v46 = vrot.slane %v5742_v29, %v1478_v33 }
 0x1f4   : > { %v4654_v56 = vld [vmem:[#allocation11 + $0x264] ss:$16 sps:$4 sm:$0xff]   ;;  %v4657_v58 = vld [vmem:[#allocation11 + $0x260] ss:$16 sps:$4 sm:$0xff]  }
 0x1f5   : > { %3096 = vmatpush1.bf16.msra.mxu0 %v4644_v49  ;;  %v4658_v60 = vld [vmem:[#allocation11 + $0x44] ss:$16 sps:$4 sm:$0xff]   ;;  %v4662_v62 = vld [vmem:[#allocation11 + $0x40] ss:$16 sps:$4 sm:$0xff]  }
 0x1f6   : > { %3137 = vmatpush1.bf16.msra.mxu1 %v4645_v50  ;;  %3097 = vmatprep.subr.bf16.mxu0 %v4646_v51  ;;  %v4660_v61 = vld [vmem:[#allocation11 + $0x244] ss:$16 sps:$4 sm:$0xff]   ;;  %v4663_v63 = vld [vmem:[#allocation11 + $0x240] ss:$16 sps:$4 sm:$0xff]  }
 0x1f7   : > { %3138 = vmatprep.subr.bf16.mxu1 %v4648_v52  ;;  %v4664_v0 = vld [vmem:[#allocation11 + $0x24] ss:$16 sps:$4 sm:$0xff]   ;;  %v4668_v2 = vld [vmem:[#allocation11 + $0x20] ss:$16 sps:$4 sm:$0xff]  }
 0x1f8   : > { %v4666_v1 = vld [vmem:[#allocation11 + $0x224] ss:$16 sps:$4 sm:$0xff]   ;;  %v4669_v3 = vld [vmem:[#allocation11 + $0x220] ss:$16 sps:$4 sm:$0xff]  }
 0x1f9   : > { %3098 = vmatpush1.bf16.msra.mxu0 %v4650_v53  ;;  %v4670_v4 = vld [vmem:[#allocation11 + $0x4] ss:$16 sps:$4 sm:$0xff]   ;;  %v4674_v6 = vld [vmem:[#allocation11] ss:$16 sps:$4 sm:$0xff]  }
 0x1fa   : > { %3139 = vmatpush1.bf16.msra.mxu1 %v4651_v54  ;;  %3099 = vmatprep.subr.bf16.mxu0 %v4652_v55  ;;  %v4672_v5 = vld [vmem:[#allocation11 + $0x204] ss:$16 sps:$4 sm:$0xff]   ;;  %v4675_v7 = vld [vmem:[#allocation11 + $0x200] ss:$16 sps:$4 sm:$0xff]  }
 0x1fb   : > { %3140 = vmatprep.subr.bf16.mxu1 %v4654_v56  ;;  %v4676_v8 = vld [vmem:[#allocation11 + $0x1e4] ss:$16 sps:$4 sm:$0xff]   ;;  %v4680_v10 = vld [vmem:[#allocation11 + $0x1e0] ss:$16 sps:$4 sm:$0xff]  }
 0x1fc   : > { %v4678_v9 = vld [vmem:[#allocation11 + $0x3e4] ss:$16 sps:$4 sm:$0xff]   ;;  %v4681_v11 = vld [vmem:[#allocation11 + $0x3e0] ss:$16 sps:$4 sm:$0xff]  }
 0x1fd   : > { %3100 = vmatpush1.bf16.msra.mxu0 %v4656_v57  ;;  %v4682_v12 = vld [vmem:[#allocation11 + $0x1c4] ss:$16 sps:$4 sm:$0xff]   ;;  %v4686_v16 = vld [vmem:[#allocation11 + $0x1c0] ss:$16 sps:$4 sm:$0xff]  }
 0x1fe   : > { %3141 = vmatpush1.bf16.msra.mxu1 %v4657_v58  ;;  %3101 = vmatprep.subr.bf16.mxu0 %v4658_v60  ;;  %v4684_v15 = vld [vmem:[#allocation11 + $0x3c4] ss:$16 sps:$4 sm:$0xff]   ;;  %v4687_v17 = vld [vmem:[#allocation11 + $0x3c0] ss:$16 sps:$4 sm:$0xff]  }
 0x1ff   : > { %3142 = vmatprep.subr.bf16.mxu1 %v4660_v61  ;;  %v4688_v18 = vld [vmem:[#allocation11 + $0x1a4] ss:$16 sps:$4 sm:$0xff]   ;;  %v4692_v21 = vld [vmem:[#allocation11 + $0x1a0] ss:$16 sps:$4 sm:$0xff]  }
 0x200   : > { %v4690_v20 = vld [vmem:[#allocation11 + $0x3a4] ss:$16 sps:$4 sm:$0xff]   ;;  %v4693_v22 = vld [vmem:[#allocation11 + $0x3a0] ss:$16 sps:$4 sm:$0xff]  }
 0x201   : > { %3102 = vmatpush1.bf16.msra.mxu0 %v4662_v62  ;;  %v4694_v23 = vld [vmem:[#allocation11 + $0x184] ss:$16 sps:$4 sm:$0xff]   ;;  %v4698_v26 = vld [vmem:[#allocation11 + $0x180] ss:$16 sps:$4 sm:$0xff]  }
 0x202   : > { %3143 = vmatpush1.bf16.msra.mxu1 %v4663_v63  ;;  %3103 = vmatprep.subr.bf16.mxu0 %v4664_v0  ;;  %v4696_v25 = vld [vmem:[#allocation11 + $0x384] ss:$16 sps:$4 sm:$0xff]   ;;  %v4699_v34 = vld [vmem:[#allocation11 + $0x380] ss:$16 sps:$4 sm:$0xff]  }
 0x203   : > { %3144 = vmatprep.subr.bf16.mxu1 %v4666_v1  ;;  %v1443_v28 = vld [vmem:[#allocation2] sm:$0xff]  ;;  %v1445_v30 = vld [vmem:[#allocation2 + $0x10] sm:$0xff]  ;;  %v4704_v40 = vld [vmem:[#allocation11 + $0x160] ss:$16 sps:$4 sm:$0xff]  }
 0x204   : > { %v4700_v37 = vld [vmem:[#allocation11 + $0x164] ss:$16 sps:$4 sm:$0xff]   ;;  %v1493_v41 = vadd.f32 %v1459_v35, %v1443_v28  ;;  %v1495_v59 = vadd.f32 %v1467_v36, %v1445_v30  ;;  %v4705_v43 = vld [vmem:[#allocation11 + $0x360] ss:$16 sps:$4 sm:$0xff]   ;;  %v1474_v36 = vsub.s32 5, %v5735_v19 }
 0x205   : > { %3104 = vmatpush1.bf16.msra.mxu0 %v4668_v2  ;;  %v4702_v38 = vld [vmem:[#allocation11 + $0x364] ss:$16 sps:$4 sm:$0xff]   ;;  %v4710_v57 = vld [vmem:[#allocation11 + $0x140] ss:$16 sps:$4 sm:$0xff]  }
 0x206   : > { %3145 = vmatpush1.bf16.msra.mxu1 %v4669_v3  ;;  %3105 = vmatprep.subr.bf16.mxu0 %v4670_v4  ;;  %v4706_v47 = vld [vmem:[#allocation11 + $0x144] ss:$16 sps:$4 sm:$0xff]   ;;  %vm1501_vm0 = vcmp.gt.f32.partialorder %v1493_v41, 0.0  ;;  %v1510_v48 = vmul.f32 %v5754_v39, %v1493_v41  ;;  %vm1503_vm1 = vcmp.gt.f32.partialorder %v1495_v59, 0.0  ;;  %v1512_v49 = vmul.f32 %v5754_v39, %v1495_v59  ;;  %v4711_v58 = vld [vmem:[#allocation11 + $0x340] ss:$16 sps:$4 sm:$0xff]  }
 0x207   : > { %3146 = vmatprep.subr.bf16.mxu1 %v4672_v5  ;;  %v4708_v50 = vld [vmem:[#allocation11 + $0x344] ss:$16 sps:$4 sm:$0xff]   ;;  %v4716_v0 = vld [vmem:[#allocation11 + $0x120] ss:$16 sps:$4 sm:$0xff]  }
 0x208   : > { %v1442_v51 = vld [vmem:[#allocation2 + $0x30] sm:$0xff]  ;;  %v1444_v52 = vld [vmem:[#allocation2 + $0x18] sm:$0xff]  ;;  %v1518_v53 = vsel %vm1501_vm0, %v1493_v41, %v1510_v48  ;;  %v1520_v54 = vsel %vm1503_vm1, %v1495_v59, %v1512_v49 }
 0x209   : > { %3106 = vmatpush1.bf16.msra.mxu0 %v4674_v6  ;;  %v5769_v55 = vpack.c.bf16 %v1518_v53, %v1518_v53  ;;  %v5771_v56 = vpack.c.bf16 %v1520_v54, %v1520_v54  ;;  %v1492_v60 = vadd.f32 %v1455_v44, %v1442_v51  ;;  %v1494_v61 = vadd.f32 %v1463_v45, %v1444_v52  ;;  %v4712_v62 = vld [vmem:[#allocation11 + $0x124] ss:$16 sps:$4 sm:$0xff]   ;;  %v4717_v1 = vld [vmem:[#allocation11 + $0x320] ss:$16 sps:$4 sm:$0xff]  }
 0x20a   : > { %3147 = vmatpush1.bf16.msra.mxu1 %v4675_v7  ;;  %3107 = vmatprep.subr.bf16.mxu0 %v4676_v8  ;;  %v4714_v63 = vld [vmem:[#allocation11 + $0x324] ss:$16 sps:$4 sm:$0xff]   ;;  %v4722_v6 = vld [vmem:[#allocation11 + $0x100] ss:$16 sps:$4 sm:$0xff]   ;;  %v1475_v45 = vrot.slane %v5742_v29, %v1474_v36 }
 0x20b   : > { %3148 = vmatprep.subr.bf16.mxu1 %v4678_v9  ;;  %3123 = vmatprep.mubr.bf16.mxu0 %v5769_v55  ;;  %v4718_v2 = vld [vmem:[#allocation11 + $0x104] ss:$16 sps:$4 sm:$0xff]   ;;  %v1509_v3 = vmul.f32 %v5754_v39, %v1492_v60  ;;  %v1511_v4 = vmul.f32 %v5754_v39, %v1494_v61  ;;  %vm1500_vm2 = vcmp.gt.f32.partialorder %v1492_v60, 0.0  ;;  %vm1502_vm3 = vcmp.gt.f32.partialorder %v1494_v61, 0.0  ;;  %v4723_v7 = vld [vmem:[#allocation11 + $0x300] ss:$16 sps:$4 sm:$0xff]  }
 0x20c   : > { %3164 = vmatprep.mubr.bf16.mxu1 %v5771_v56  ;;  %v4720_v5 = vld [vmem:[#allocation11 + $0x304] ss:$16 sps:$4 sm:$0xff]   ;;  %v4742_v30 = vld [vmem:[#allocation11 + $0x480] ss:$16 sps:$4 sm:$0xff]  }
 0x20d   : > { %3108 = vmatpush2.bf16.msra.mxu0 %v4680_v10  ;;  %v1517_v8 = vsel %vm1500_vm2, %v1492_v60, %v1509_v3  ;;  %v1519_v9 = vsel %vm1502_vm3, %v1494_v61, %v1511_v4  ;;  %v4726_v10 = vld [vmem:[#allocation11 + $0x4e4] ss:$16 sps:$4 sm:$0xff]   ;;  %v4745_v33 = vld [vmem:[#allocation11 + $0x680] ss:$16 sps:$4 sm:$0xff]  }
 0x20e   : > { %3149 = vmatpush2.bf16.msra.mxu1 %v4681_v11  ;;  %3109 = vmatprep.subr.bf16.mxu0 %v4682_v12  ;;  %v4729_v11 = vld [vmem:[#allocation11 + $0x6e4] ss:$16 sps:$4 sm:$0xff]   ;;  %v5777_v12 = vpack.c.bf16 %v1517_v8, %v1517_v8  ;;  %v5779_v13 = vpack.c.bf16 %v1519_v9, %v1519_v9  ;;  %v4757_v44 = vld [vmem:[#allocation11 + $0x640] ss:$16 sps:$4 sm:$0xff]  }
 0x20f   : > { %3150 = vmatprep.subr.bf16.mxu1 %v4684_v15  ;;  %v4724_v15 = vld [vmem:[#allocation11 + $0x4e0] ss:$16 sps:$4 sm:$0xff]   ;;  %v4744_v27 = vld [vmem:[#allocation11 + $0x484] ss:$16 sps:$4 sm:$0xff]  }
 0x210   : > { %v4747_v28 = vld [vmem:[#allocation11 + $0x684] ss:$16 sps:$4 sm:$0xff]   ;;  %v4763_v51 = vld [vmem:[#allocation11 + $0x620] ss:$16 sps:$4 sm:$0xff]  }
 0x211   : > { %3110 = vmatpush2.bf16.msra.mxu0 %v4686_v16  ;;  %v4727_v16 = vld [vmem:[#allocation11 + $0x6e0] ss:$16 sps:$4 sm:$0xff]   ;;  %v4753_v35 = vld [vmem:[#allocation11 + $0x664] ss:$16 sps:$4 sm:$0xff]  }
 0x212   : > { %3151 = vmatpush2.bf16.msra.mxu1 %v4687_v17  ;;  %3111 = vmatprep.subr.bf16.mxu0 %v4688_v18  ;;  %v4732_v17 = vld [vmem:[#allocation11 + $0x4c4] ss:$16 sps:$4 sm:$0xff]   ;;  %v4766_v4 = vld [vmem:[#allocation11 + $0x400] ss:$16 sps:$4 sm:$0xff]  }
 0x213   : > { %3152 = vmatprep.subr.bf16.mxu1 %v4690_v20  ;;  %v4735_v18 = vld [vmem:[#allocation11 + $0x6c4] ss:$16 sps:$4 sm:$0xff]   ;;  %v4730_v20 = vld [vmem:[#allocation11 + $0x4c0] ss:$16 sps:$4 sm:$0xff]  }
 0x214   : > { %v4756_v41 = vld [vmem:[#allocation11 + $0x444] ss:$16 sps:$4 sm:$0xff]   ;;  %v4799_v36 = vld [vmem:[#allocation11 + $0x760] ss:$16 sps:$4 sm:$0xff]  }
 0x215   : > { %3112 = vmatpush2.bf16.msra.mxu0 %v4692_v21  ;;  %v4733_v21 = vld [vmem:[#allocation11 + $0x6c0] ss:$16 sps:$4 sm:$0xff]   ;;  %v4759_v59 = vld [vmem:[#allocation11 + $0x644] ss:$16 sps:$4 sm:$0xff]  }
 0x216   : > { %3153 = vmatpush2.bf16.msra.mxu1 %v4693_v22  ;;  %3113 = vmatprep.subr.bf16.mxu0 %v4694_v23  ;;  %v4738_v22 = vld [vmem:[#allocation11 + $0x4a4] ss:$16 sps:$4 sm:$0xff]  }
 0x217   : > { %3154 = vmatprep.subr.bf16.mxu1 %v4696_v25  ;;  %v4741_v23 = vld [vmem:[#allocation11 + $0x6a4] ss:$16 sps:$4 sm:$0xff]   ;;  %v4736_v25 = vld [vmem:[#allocation11 + $0x4a0] ss:$16 sps:$4 sm:$0xff]  }
 0x218   : > { %v4762_v48 = vld [vmem:[#allocation11 + $0x424] ss:$16 sps:$4 sm:$0xff]  }
 0x219   : > { %3114 = vmatpush2.bf16.msra.mxu0 %v4698_v26  ;;  %v4739_v26 = vld [vmem:[#allocation11 + $0x6a0] ss:$16 sps:$4 sm:$0xff]   ;;  %v4765_v49 = vld [vmem:[#allocation11 + $0x624] ss:$16 sps:$4 sm:$0xff]  }
 0x21a   : > { %3155 = vmatpush2.bf16.msra.mxu1 %v4699_v34  ;;  %3115 = vmatprep.subr.bf16.mxu0 %v4700_v37  ;;  %v4750_v34 = vld [vmem:[#allocation11 + $0x464] ss:$16 sps:$4 sm:$0xff]   ;;  %v4748_v37 = vld [vmem:[#allocation11 + $0x460] ss:$16 sps:$4 sm:$0xff]  }
 0x21b   : > { %3156 = vmatprep.subr.bf16.mxu1 %v4702_v38  ;;  %v4751_v38 = vld [vmem:[#allocation11 + $0x660] ss:$16 sps:$4 sm:$0xff]   ;;  %v1447_v52 = vld [vmem:[#allocation2 + $0x20] sm:$0xff] }
 0x21c   : > { %v1449_v53 = vld [vmem:[#allocation2 + $0x38] sm:$0xff]  ;;  %v1497_v54 = vadd.f32 %v1475_v45, %v1447_v52  ;;  %v1448_v60 = vld [vmem:[#allocation2 + $0x28] sm:$0xff] }
 0x21d   : > { %3116 = vmatpush2.bf16.msra.mxu0 %v4704_v40  ;;  %v1482_v40 = vsub.s32 7, %v5735_v19  ;;  %v4768_v61 = vld [vmem:[#allocation11 + $0x404] ss:$16 sps:$4 sm:$0xff]   ;;  %v4811_v45 = vld [vmem:[#allocation11 + $0x720] ss:$16 sps:$4 sm:$0xff]  }
 0x21e   : > { %3157 = vmatpush2.bf16.msra.mxu1 %v4705_v43  ;;  %3117 = vmatprep.subr.bf16.mxu0 %v4706_v47  ;;  %v4754_v43 = vld [vmem:[#allocation11 + $0x440] ss:$16 sps:$4 sm:$0xff]   ;;  %vm1505_vm4 = vcmp.gt.f32.partialorder %v1497_v54, 0.0  ;;  %v4825_v52 = vld [vmem:[#allocation11 + $0x2ec] ss:$16 sps:$4 sm:$0xff]  }
 0x21f   : > { %3158 = vmatprep.subr.bf16.mxu1 %v4708_v50  ;;  %v1483_v47 = vrot.slane %v5742_v29, %v1482_v40  ;;  %v4760_v50 = vld [vmem:[#allocation11 + $0x420] ss:$16 sps:$4 sm:$0xff]  }
 0x220   : > { %v4802_v40 = vld [vmem:[#allocation11 + $0x540] ss:$16 sps:$4 sm:$0xff]  }
 0x221   : > { %3118 = vmatpush2.bf16.msra.mxu0 %v4710_v57  ;;  %v1499_v57 = vadd.f32 %v1483_v47, %v1449_v53  ;;  %v4816_v47 = vld [vmem:[#allocation11 + $0x504] ss:$16 sps:$4 sm:$0xff]  }
 0x222   : > { %3159 = vmatpush2.bf16.msra.mxu1 %v4711_v58  ;;  %3119 = vmatprep.subr.bf16.mxu0 %v4712_v62  ;;  %v1446_v58 = vld [vmem:[#allocation2 + $0x8] sm:$0xff] }
 0x223   : > { %3160 = vmatprep.subr.bf16.mxu1 %v4714_v63  ;;  %v4771_v62 = vld [vmem:[#allocation11 + $0x604] ss:$16 sps:$4 sm:$0xff]   ;;  %v1496_v29 = vadd.f32 %v5757_v42, %v1446_v58  ;;  %v1498_v63 = vadd.f32 %v5765_v46, %v1448_v60  ;;  %vm1507_vm5 = vcmp.gt.f32.partialorder %v1499_v57, 0.0  ;;  %v4823_v58 = vld [vmem:[#allocation11 + $0x2e8] ss:$16 sps:$4 sm:$0xff]  }
 0x224   : > { %v4774_v46 = vld [vmem:[#allocation11 + $0x5e4] ss:$16 sps:$4 sm:$0xff]   ;;  %v4828_v60 = vld [vmem:[#allocation11 + $0xcc] ss:$16 sps:$4 sm:$0xff]  }
 0x225   : > { %3120 = vmatpush2.bf16.msra.mxu0 %v4716_v0  ;;  %v1514_v0 = vmul.f32 %v5754_v39, %v1497_v54  ;;  %vm1504_vm6 = vcmp.gt.f32.partialorder %v1496_v29, 0.0  ;;  %vm1506_vm7 = vcmp.gt.f32.partialorder %v1498_v63, 0.0  ;;  %v1515_v3 = vmul.f32 %v5754_v39, %v1498_v63 }
 0x226   : > { %3161 = vmatpush2.bf16.msra.mxu1 %v4717_v1  ;;  %3121 = vmatprep.subr.bf16.mxu0 %v4718_v2  ;;  %v1516_v1 = vmul.f32 %v5754_v39, %v1499_v57  ;;  %v1513_v2 = vmul.f32 %v5754_v39, %v1496_v29  ;;  %v4772_v39 = vld [vmem:[#allocation11 + $0x5e0] ss:$16 sps:$4 sm:$0xff]  }
 0x227   : > { %3162 = vmatprep.subr.bf16.mxu1 %v4720_v5  ;;  %v4769_v5 = vld [vmem:[#allocation11 + $0x600] ss:$16 sps:$4 sm:$0xff]  }
 0x228   : > { %v1524_v42 = vsel %vm1507_vm5, %v1499_v57, %v1516_v1  ;;  %v4820_v57 = vld [vmem:[#allocation11 + $0xe8] ss:$16 sps:$4 sm:$0xff]  }
 0x229   : > { %3122 = vmatpush2.bf16.msra.mxu0 %v4722_v6  ;;  %v1522_v6 = vsel %vm1505_vm4, %v1497_v54, %v1514_v0  ;;  %v5795_v9 = vpack.c.bf16 %v1524_v42, %v1524_v42  ;;  %v4837_v0 = vld [vmem:[#allocation11 + $0x2ac] ss:$16 sps:$4 sm:$0xff]   ;;  %v4832_v1 = vld [vmem:[#allocation11 + $0xa8] ss:$16 sps:$4 sm:$0xff]  }
 0x22a   : > { %3163 = vmatpush2.bf16.msra.mxu1 %v4723_v7  ;;  %3173 = vmatprep.subr.bf16.mxu0 %v4726_v10  ;;  %v4777_v7 = vld [vmem:[#allocation11 + $0x7e4] ss:$16 sps:$4 sm:$0xff]   ;;  %v5793_v8 = vpack.c.bf16 %v1522_v6, %v1522_v6  ;;  %v5798_v10 = vsel %vm1504_vm6, %v1496_v29, %v1513_v2  ;;  %v4829_v29 = vld [vmem:[#allocation11 + $0x2c8] ss:$16 sps:$4 sm:$0xff]   ;;  %v4846_v42 = vld [vmem:[#allocation11 + $0x6c] ss:$16 sps:$4 sm:$0xff]  }
 0x22b   : > { %3214 = vmatprep.subr.bf16.mxu1 %v4729_v11  ;;  %v5800_v11 = vsel %vm1506_vm7, %v1498_v63, %v1515_v3  ;;  %v5806_v53 = vpack.c.bf16 %v5798_v10, %v5798_v10  ;;  %v4834_v63 = vld [vmem:[#allocation11 + $0xac] ss:$16 sps:$4 sm:$0xff]   ;;  %v4835_v2 = vld [vmem:[#allocation11 + $0x2a8] ss:$16 sps:$4 sm:$0xff]  }
 0x22c   : > { %3124 = vmatmul.mubr.bf16.vlgmr.msra.gmra.mxu0 %v5777_v12  ;;  %v5810_v54 = vpack.c.bf16 %v5800_v11, %v5800_v11  ;;  %v4840_v3 = vld [vmem:[#allocation11 + $0x8c] ss:$16 sps:$4 sm:$0xff]   ;;  %v4841_v6 = vld [vmem:[#allocation11 + $0x288] ss:$16 sps:$4 sm:$0xff]  }
 0x22d   : > { %3165 = vmatmul.mubr.bf16.vlgmr.msra.gmra.mxu1 %v5779_v13  ;;  %3174 = vmatpush1.bf16.msra.mxu0 %v4724_v15  ;;  %v4775_v15 = vld [vmem:[#allocation11 + $0x7e0] ss:$16 sps:$4 sm:$0xff]   ;;  %v4855_v10 = vld [vmem:[#allocation11 + $0x24c] ss:$16 sps:$4 sm:$0xff]   ;;  %v4850_v11 = vld [vmem:[#allocation11 + $0x48] ss:$16 sps:$4 sm:$0xff]  }
 0x22e   : > { %3215 = vmatpush1.bf16.msra.mxu1 %v4727_v16  ;;  %3175 = vmatprep.subr.bf16.mxu0 %v4732_v17  ;;  %v4780_v16 = vld [vmem:[#allocation11 + $0x5c4] ss:$16 sps:$4 sm:$0xff]  }
 0x22f   : > { %3216 = vmatprep.subr.bf16.mxu1 %v4735_v18  ;;  %3205 = vmatprep.mubr.bf16.mxu0 %v5793_v8  ;;  %v4783_v17 = vld [vmem:[#allocation11 + $0x7c4] ss:$16 sps:$4 sm:$0xff]   ;;  %v4778_v18 = vld [vmem:[#allocation11 + $0x5c0] ss:$16 sps:$4 sm:$0xff]  }
 0x230   : > { %3246 = vmatprep.mubr.bf16.mxu1 %v5795_v9 }
 0x231   : > { %3176 = vmatpush1.bf16.msra.mxu0 %v4730_v20  ;;  %v4781_v20 = vld [vmem:[#allocation11 + $0x7c0] ss:$16 sps:$4 sm:$0xff]  }
 0x232   : > { %3217 = vmatpush1.bf16.msra.mxu1 %v4733_v21  ;;  %3177 = vmatprep.subr.bf16.mxu0 %v4738_v22  ;;  %v4786_v21 = vld [vmem:[#allocation11 + $0x5a4] ss:$16 sps:$4 sm:$0xff]  }
 0x233   : > { %3218 = vmatprep.subr.bf16.mxu1 %v4741_v23  ;;  %v4789_v22 = vld [vmem:[#allocation11 + $0x7a4] ss:$16 sps:$4 sm:$0xff]   ;;  %v4784_v23 = vld [vmem:[#allocation11 + $0x5a0] ss:$16 sps:$4 sm:$0xff]  }
 0x235   : > { %3178 = vmatpush1.bf16.msra.mxu0 %v4736_v25  ;;  %v4787_v25 = vld [vmem:[#allocation11 + $0x7a0] ss:$16 sps:$4 sm:$0xff]  }
 0x236   : > { %3219 = vmatpush1.bf16.msra.mxu1 %v4739_v26  ;;  %3179 = vmatprep.subr.bf16.mxu0 %v4744_v27  ;;  %v4792_v26 = vld [vmem:[#allocation11 + $0x584] ss:$16 sps:$4 sm:$0xff]  }
 0x237   : > { %3220 = vmatprep.subr.bf16.mxu1 %v4747_v28  ;;  %v4795_v27 = vld [vmem:[#allocation11 + $0x784] ss:$16 sps:$4 sm:$0xff]   ;;  %v4790_v28 = vld [vmem:[#allocation11 + $0x580] ss:$16 sps:$4 sm:$0xff]  }
 0x239   : > { %3180 = vmatpush1.bf16.msra.mxu0 %v4742_v30  ;;  %v4793_v30 = vld [vmem:[#allocation11 + $0x780] ss:$16 sps:$4 sm:$0xff]  }
 0x23a   : > { %3221 = vmatpush1.bf16.msra.mxu1 %v4745_v33  ;;  %3181 = vmatprep.subr.bf16.mxu0 %v4750_v34  ;;  %v4798_v33 = vld [vmem:[#allocation11 + $0x564] ss:$16 sps:$4 sm:$0xff]  }
 0x23b   : > { %3222 = vmatprep.subr.bf16.mxu1 %v4753_v35  ;;  %v4801_v34 = vld [vmem:[#allocation11 + $0x764] ss:$16 sps:$4 sm:$0xff]   ;;  %v4796_v35 = vld [vmem:[#allocation11 + $0x560] ss:$16 sps:$4 sm:$0xff]  }
 0x23d   : > { %3182 = vmatpush1.bf16.msra.mxu0 %v4748_v37  ;;  %v4804_v37 = vld [vmem:[#allocation11 + $0x544] ss:$16 sps:$4 sm:$0xff]  }
 0x23e   : > { %3223 = vmatpush1.bf16.msra.mxu1 %v4751_v38  ;;  %3183 = vmatprep.subr.bf16.mxu0 %v4756_v41  ;;  %v4807_v38 = vld [vmem:[#allocation11 + $0x744] ss:$16 sps:$4 sm:$0xff]   ;;  %v4805_v41 = vld [vmem:[#allocation11 + $0x740] ss:$16 sps:$4 sm:$0xff]  }
 0x23f   : > { %3224 = vmatprep.subr.bf16.mxu1 %v4759_v59  ;;  %v4810_v59 = vld [vmem:[#allocation11 + $0x524] ss:$16 sps:$4 sm:$0xff]  }
 0x241   : > { %3184 = vmatpush1.bf16.msra.mxu0 %v4754_v43  ;;  %v4813_v43 = vld [vmem:[#allocation11 + $0x724] ss:$16 sps:$4 sm:$0xff]  }
 0x242   : > { %3225 = vmatpush1.bf16.msra.mxu1 %v4757_v44  ;;  %3185 = vmatprep.subr.bf16.mxu0 %v4762_v48  ;;  %v4808_v44 = vld [vmem:[#allocation11 + $0x520] ss:$16 sps:$4 sm:$0xff]   ;;  %v4819_v48 = vld [vmem:[#allocation11 + $0x704] ss:$16 sps:$4 sm:$0xff]  }
 0x243   : > { %3226 = vmatprep.subr.bf16.mxu1 %v4765_v49  ;;  %v4814_v49 = vld [vmem:[#allocation11 + $0x500] ss:$16 sps:$4 sm:$0xff]  }
 0x245   : > { %3186 = vmatpush1.bf16.msra.mxu0 %v4760_v50  ;;  %v4817_v50 = vld [vmem:[#allocation11 + $0x700] ss:$16 sps:$4 sm:$0xff]  }
 0x246   : > { %3227 = vmatpush1.bf16.msra.mxu1 %v4763_v51  ;;  %3187 = vmatprep.subr.bf16.mxu0 %v4768_v61  ;;  %v4822_v51 = vld [vmem:[#allocation11 + $0xec] ss:$16 sps:$4 sm:$0xff]  }
 0x247   : > { %3228 = vmatprep.subr.bf16.mxu1 %v4771_v62  ;;  %v4831_v61 = vld [vmem:[#allocation11 + $0x2cc] ss:$16 sps:$4 sm:$0xff]   ;;  %v4826_v62 = vld [vmem:[#allocation11 + $0xc8] ss:$16 sps:$4 sm:$0xff]  }
 0x249   : > { %3188 = vmatpush1.bf16.msra.mxu0 %v4766_v4  ;;  %v4843_v4 = vld [vmem:[#allocation11 + $0x28c] ss:$16 sps:$4 sm:$0xff]  }
 0x24a   : > { %3229 = vmatpush1.bf16.msra.mxu1 %v4769_v5  ;;  %3189 = vmatprep.subr.bf16.mxu0 %v4774_v46  ;;  %v4838_v5 = vld [vmem:[#allocation11 + $0x88] ss:$16 sps:$4 sm:$0xff]   ;;  %v4849_v46 = vld [vmem:[#allocation11 + $0x26c] ss:$16 sps:$4 sm:$0xff]  }
 0x24b   : > { %3230 = vmatprep.subr.bf16.mxu1 %v4777_v7  ;;  %v4852_v7 = vld [vmem:[#allocation11 + $0x4c] ss:$16 sps:$4 sm:$0xff]  }
 0x24d   : > { %3190 = vmatpush2.bf16.msra.mxu0 %v4772_v39  ;;  %v4853_v39 = vld [vmem:[#allocation11 + $0x248] ss:$16 sps:$4 sm:$0xff]  }
 0x24e   : > { %3231 = vmatpush2.bf16.msra.mxu1 %v4775_v15  ;;  %3191 = vmatprep.subr.bf16.mxu0 %v4780_v16  ;;  %v4858_v15 = vld [vmem:[#allocation11 + $0x2c] ss:$16 sps:$4 sm:$0xff]  }
 0x24f   : > { %3232 = vmatprep.subr.bf16.mxu1 %v4783_v17  ;;  %v4861_v16 = vld [vmem:[#allocation11 + $0x22c] ss:$16 sps:$4 sm:$0xff]   ;;  %v4856_v17 = vld [vmem:[#allocation11 + $0x28] ss:$16 sps:$4 sm:$0xff]  }
 0x251   : > { %3192 = vmatpush2.bf16.msra.mxu0 %v4778_v18  ;;  %v4859_v18 = vld [vmem:[#allocation11 + $0x228] ss:$16 sps:$4 sm:$0xff]  }
 0x252   : > { %3233 = vmatpush2.bf16.msra.mxu1 %v4781_v20  ;;  %3193 = vmatprep.subr.bf16.mxu0 %v4786_v21  ;;  %v4864_v20 = vld [vmem:[#allocation11 + $0xc] ss:$16 sps:$4 sm:$0xff]  }
 0x253   : > { %3234 = vmatprep.subr.bf16.mxu1 %v4789_v22  ;;  %v4867_v21 = vld [vmem:[#allocation11 + $0x20c] ss:$16 sps:$4 sm:$0xff]   ;;  %v4862_v22 = vld [vmem:[#allocation11 + $0x8] ss:$16 sps:$4 sm:$0xff]  }
 0x255   : > { %3194 = vmatpush2.bf16.msra.mxu0 %v4784_v23  ;;  %v4865_v23 = vld [vmem:[#allocation11 + $0x208] ss:$16 sps:$4 sm:$0xff]  }
 0x256   : > { %3235 = vmatpush2.bf16.msra.mxu1 %v4787_v25  ;;  %3195 = vmatprep.subr.bf16.mxu0 %v4792_v26  ;;  %v4870_v25 = vld [vmem:[#allocation11 + $0x1ec] ss:$16 sps:$4 sm:$0xff]  }
 0x257   : > { %3236 = vmatprep.subr.bf16.mxu1 %v4795_v27  ;;  %v4873_v26 = vld [vmem:[#allocation11 + $0x3ec] ss:$16 sps:$4 sm:$0xff]   ;;  %v4868_v27 = vld [vmem:[#allocation11 + $0x1e8] ss:$16 sps:$4 sm:$0xff]  }
 0x259   : > { %3196 = vmatpush2.bf16.msra.mxu0 %v4790_v28  ;;  %v4871_v28 = vld [vmem:[#allocation11 + $0x3e8] ss:$16 sps:$4 sm:$0xff]  }
 0x25a   : > { %3237 = vmatpush2.bf16.msra.mxu1 %v4793_v30  ;;  %3197 = vmatprep.subr.bf16.mxu0 %v4798_v33  ;;  %v4876_v30 = vld [vmem:[#allocation11 + $0x1cc] ss:$16 sps:$4 sm:$0xff]  }
 0x25b   : > { %3238 = vmatprep.subr.bf16.mxu1 %v4801_v34  ;;  %v4879_v33 = vld [vmem:[#allocation11 + $0x3cc] ss:$16 sps:$4 sm:$0xff]   ;;  %v4874_v34 = vld [vmem:[#allocation11 + $0x1c8] ss:$16 sps:$4 sm:$0xff]  }
 0x25d   : > { %3198 = vmatpush2.bf16.msra.mxu0 %v4796_v35  ;;  %v4877_v35 = vld [vmem:[#allocation11 + $0x3c8] ss:$16 sps:$4 sm:$0xff]  }
 0x25e   : > { %3239 = vmatpush2.bf16.msra.mxu1 %v4799_v36  ;;  %3199 = vmatprep.subr.bf16.mxu0 %v4804_v37  ;;  %v4882_v36 = vld [vmem:[#allocation11 + $0x1ac] ss:$16 sps:$4 sm:$0xff]  }
 0x25f   : > { %3240 = vmatprep.subr.bf16.mxu1 %v4807_v38  ;;  %v4885_v37 = vld [vmem:[#allocation11 + $0x3ac] ss:$16 sps:$4 sm:$0xff]   ;;  %v4880_v38 = vld [vmem:[#allocation11 + $0x1a8] ss:$16 sps:$4 sm:$0xff]  }
 0x261   : > { %3200 = vmatpush2.bf16.msra.mxu0 %v4802_v40  ;;  %v4883_v40 = vld [vmem:[#allocation11 + $0x3a8] ss:$16 sps:$4 sm:$0xff]  }
 0x262   : > { %3241 = vmatpush2.bf16.msra.mxu1 %v4805_v41  ;;  %3201 = vmatprep.subr.bf16.mxu0 %v4810_v59  ;;  %v4888_v41 = vld [vmem:[#allocation11 + $0x18c] ss:$16 sps:$4 sm:$0xff]  }
 0x263   : > { %3242 = vmatprep.subr.bf16.mxu1 %v4813_v43  ;;  %v4891_v59 = vld [vmem:[#allocation11 + $0x38c] ss:$16 sps:$4 sm:$0xff]   ;;  %v4886_v43 = vld [vmem:[#allocation11 + $0x188] ss:$16 sps:$4 sm:$0xff]  }
 0x265   : > { %3202 = vmatpush2.bf16.msra.mxu0 %v4808_v44  ;;  %v4889_v44 = vld [vmem:[#allocation11 + $0x388] ss:$16 sps:$4 sm:$0xff]  }
 0x266   : > { %3243 = vmatpush2.bf16.msra.mxu1 %v4811_v45  ;;  %3203 = vmatprep.subr.bf16.mxu0 %v4816_v47  ;;  %v4894_v45 = vld [vmem:[#allocation11 + $0x16c] ss:$16 sps:$4 sm:$0xff]  }
 0x267   : > { %3244 = vmatprep.subr.bf16.mxu1 %v4819_v48  ;;  %v4897_v47 = vld [vmem:[#allocation11 + $0x36c] ss:$16 sps:$4 sm:$0xff]   ;;  %v4892_v48 = vld [vmem:[#allocation11 + $0x168] ss:$16 sps:$4 sm:$0xff]  }
 0x269   : > { %3204 = vmatpush2.bf16.msra.mxu0 %v4814_v49  ;;  %v4895_v49 = vld [vmem:[#allocation11 + $0x368] ss:$16 sps:$4 sm:$0xff]  }
 0x26a   : > { %3245 = vmatpush2.bf16.msra.mxu1 %v4817_v50  ;;  %3255 = vmatprep.subr.bf16.mxu0 %v4822_v51  ;;  %v4900_v50 = vld [vmem:[#allocation11 + $0x14c] ss:$16 sps:$4 sm:$0xff]  }
 0x26b   : > { %3296 = vmatprep.subr.bf16.mxu1 %v4825_v52  ;;  %v4903_v51 = vld [vmem:[#allocation11 + $0x34c] ss:$16 sps:$4 sm:$0xff]   ;;  %v4898_v52 = vld [vmem:[#allocation11 + $0x148] ss:$16 sps:$4 sm:$0xff]  }
 0x26c   : > { %3206 = vmatmul.mubr.bf16.vlgmr.msra.gmra.mxu0 %v5806_v53 }
 0x26d   : > { %3247 = vmatmul.mubr.bf16.vlgmr.msra.gmra.mxu1 %v5810_v54  ;;  %3256 = vmatpush1.bf16.msra.mxu0 %v4820_v57  ;;  %v4901_v57 = vld [vmem:[#allocation11 + $0x348] ss:$16 sps:$4 sm:$0xff]  }
 0x26e   : > { %3297 = vmatpush1.bf16.msra.mxu1 %v4823_v58  ;;  %3257 = vmatprep.subr.bf16.mxu0 %v4828_v60  ;;  %v4906_v58 = vld [vmem:[#allocation11 + $0x12c] ss:$16 sps:$4 sm:$0xff]  }
 0x26f   : > { %3298 = vmatprep.subr.bf16.mxu1 %v4831_v61  ;;  %3287 = vmatprep.mubr.bf16.mxu0 %v5769_v55  ;;  %v4844_v55 = vld [vmem:[#allocation11 + $0x68] ss:$16 sps:$4 sm:$0xff]   ;;  %v4909_v60 = vld [vmem:[#allocation11 + $0x32c] ss:$16 sps:$4 sm:$0xff]  }
 0x270   : > { %3328 = vmatprep.mubr.bf16.mxu1 %v5771_v56  ;;  %v4847_v56 = vld [vmem:[#allocation11 + $0x268] ss:$16 sps:$4 sm:$0xff]  }
 0x271   : > { %3258 = vmatpush1.bf16.msra.mxu0 %v4826_v62  ;;  %v4904_v61 = vld [vmem:[#allocation11 + $0x128] ss:$16 sps:$4 sm:$0xff]  }
 0x272   : > { %3299 = vmatpush1.bf16.msra.mxu1 %v4829_v29  ;;  %3259 = vmatprep.subr.bf16.mxu0 %v4834_v63  ;;  %v4907_v62 = vld [vmem:[#allocation11 + $0x328] ss:$16 sps:$4 sm:$0xff]   ;;  %v4912_v29 = vld [vmem:[#allocation11 + $0x10c] ss:$16 sps:$4 sm:$0xff]  }
 0x273   : > { %3300 = vmatprep.subr.bf16.mxu1 %v4837_v0  ;;  %v4915_v63 = vld [vmem:[#allocation11 + $0x30c] ss:$16 sps:$4 sm:$0xff]   ;;  %v4910_v0 = vld [vmem:[#allocation11 + $0x108] ss:$16 sps:$4 sm:$0xff]  }
 0x275   : > { %3260 = vmatpush1.bf16.msra.mxu0 %v4832_v1  ;;  %v4913_v1 = vld [vmem:[#allocation11 + $0x308] ss:$16 sps:$4 sm:$0xff]  }
 0x276   : > { %3301 = vmatpush1.bf16.msra.mxu1 %v4835_v2  ;;  %3261 = vmatprep.subr.bf16.mxu0 %v4840_v3  ;;  %v4918_v2 = vld [vmem:[#allocation11 + $0x4ec] ss:$16 sps:$4 sm:$0xff]  }
 0x277   : > { %3302 = vmatprep.subr.bf16.mxu1 %v4843_v4  ;;  %v4921_v3 = vld [vmem:[#allocation11 + $0x6ec] ss:$16 sps:$4 sm:$0xff]   ;;  %v4916_v4 = vld [vmem:[#allocation11 + $0x4e8] ss:$16 sps:$4 sm:$0xff]  }
 0x279   : > { %3262 = vmatpush1.bf16.msra.mxu0 %v4838_v5  ;;  %v4919_v5 = vld [vmem:[#allocation11 + $0x6e8] ss:$16 sps:$4 sm:$0xff]  }
 0x27a   : > { %3303 = vmatpush1.bf16.msra.mxu1 %v4841_v6  ;;  %3263 = vmatprep.subr.bf16.mxu0 %v4846_v42  ;;  %v4924_v6 = vld [vmem:[#allocation11 + $0x4cc] ss:$16 sps:$4 sm:$0xff]  }
 0x27b   : > { %3304 = vmatprep.subr.bf16.mxu1 %v4849_v46  ;;  %v4927_v42 = vld [vmem:[#allocation11 + $0x6cc] ss:$16 sps:$4 sm:$0xff]   ;;  %v4922_v46 = vld [vmem:[#allocation11 + $0x4c8] ss:$16 sps:$4 sm:$0xff]  }
 0x27d   : > { %3264 = vmatpush1.bf16.msra.mxu0 %v4844_v55  ;;  %v4925_v55 = vld [vmem:[#allocation11 + $0x6c8] ss:$16 sps:$4 sm:$0xff]  }
 0x27e   : > { %3305 = vmatpush1.bf16.msra.mxu1 %v4847_v56  ;;  %3265 = vmatprep.subr.bf16.mxu0 %v4852_v7  ;;  %v4930_v56 = vld [vmem:[#allocation11 + $0x4ac] ss:$16 sps:$4 sm:$0xff]  }
 0x27f   : > { %3306 = vmatprep.subr.bf16.mxu1 %v4855_v10  ;;  %v4933_v7 = vld [vmem:[#allocation11 + $0x6ac] ss:$16 sps:$4 sm:$0xff]   ;;  %v4928_v10 = vld [vmem:[#allocation11 + $0x4a8] ss:$16 sps:$4 sm:$0xff]  }
 0x281   : > { %3266 = vmatpush1.bf16.msra.mxu0 %v4850_v11  ;;  %v4931_v11 = vld [vmem:[#allocation11 + $0x6a8] ss:$16 sps:$4 sm:$0xff]  }
 0x282   : > { %3307 = vmatpush1.bf16.msra.mxu1 %v4853_v39  ;;  %3267 = vmatprep.subr.bf16.mxu0 %v4858_v15  ;;  %v4936_v39 = vld [vmem:[#allocation11 + $0x48c] ss:$16 sps:$4 sm:$0xff]  }
 0x283   : > { %3308 = vmatprep.subr.bf16.mxu1 %v4861_v16  ;;  %v4939_v15 = vld [vmem:[#allocation11 + $0x68c] ss:$16 sps:$4 sm:$0xff]  }
 0x284   : > { %v4942_v16 = vld [vmem:[#allocation11 + $0x46c] ss:$16 sps:$4 sm:$0xff]  }
 0x285   : > { %3268 = vmatpush1.bf16.msra.mxu0 %v4856_v17  ;;  %v4945_v17 = vld [vmem:[#allocation11 + $0x66c] ss:$16 sps:$4 sm:$0xff]  }
 0x286   : > { %3309 = vmatpush1.bf16.msra.mxu1 %v4859_v18  ;;  %3269 = vmatprep.subr.bf16.mxu0 %v4864_v20  ;;  %v4940_v18 = vld [vmem:[#allocation11 + $0x468] ss:$16 sps:$4 sm:$0xff]   ;;  %v4951_v20 = vld [vmem:[#allocation11 + $0x64c] ss:$16 sps:$4 sm:$0xff]  }
 0x287   : > { %3310 = vmatprep.subr.bf16.mxu1 %v4867_v21  ;;  %v4946_v21 = vld [vmem:[#allocation11 + $0x448] ss:$16 sps:$4 sm:$0xff]  }
 0x289   : > { %3270 = vmatpush1.bf16.msra.mxu0 %v4862_v22  ;;  %v4949_v22 = vld [vmem:[#allocation11 + $0x648] ss:$16 sps:$4 sm:$0xff]  }
 0x28a   : > { %3311 = vmatpush1.bf16.msra.mxu1 %v4865_v23  ;;  %3271 = vmatprep.subr.bf16.mxu0 %v4870_v25  ;;  %v4954_v23 = vld [vmem:[#allocation11 + $0x42c] ss:$16 sps:$4 sm:$0xff]  }
 0x28b   : > { %3312 = vmatprep.subr.bf16.mxu1 %v4873_v26  ;;  %v4957_v25 = vld [vmem:[#allocation11 + $0x62c] ss:$16 sps:$4 sm:$0xff]   ;;  %v4952_v26 = vld [vmem:[#allocation11 + $0x428] ss:$16 sps:$4 sm:$0xff]  }
 0x28d   : > { %3272 = vmatpush2.bf16.msra.mxu0 %v4868_v27  ;;  %v4955_v27 = vld [vmem:[#allocation11 + $0x628] ss:$16 sps:$4 sm:$0xff]  }
 0x28e   : > { %3313 = vmatpush2.bf16.msra.mxu1 %v4871_v28  ;;  %3273 = vmatprep.subr.bf16.mxu0 %v4876_v30  ;;  %v4960_v28 = vld [vmem:[#allocation11 + $0x40c] ss:$16 sps:$4 sm:$0xff]  }
 0x28f   : > { %3314 = vmatprep.subr.bf16.mxu1 %v4879_v33  ;;  %v4963_v30 = vld [vmem:[#allocation11 + $0x60c] ss:$16 sps:$4 sm:$0xff]   ;;  %v4958_v33 = vld [vmem:[#allocation11 + $0x408] ss:$16 sps:$4 sm:$0xff]  }
 0x291   : > { %3274 = vmatpush2.bf16.msra.mxu0 %v4874_v34  ;;  %v4961_v34 = vld [vmem:[#allocation11 + $0x608] ss:$16 sps:$4 sm:$0xff]  }
 0x292   : > { %3315 = vmatpush2.bf16.msra.mxu1 %v4877_v35  ;;  %3275 = vmatprep.subr.bf16.mxu0 %v4882_v36  ;;  %v4966_v35 = vld [vmem:[#allocation11 + $0x5ec] ss:$16 sps:$4 sm:$0xff]  }
 0x293   : > { %3316 = vmatprep.subr.bf16.mxu1 %v4885_v37  ;;  %v4969_v36 = vld [vmem:[#allocation11 + $0x7ec] ss:$16 sps:$4 sm:$0xff]   ;;  %v4964_v37 = vld [vmem:[#allocation11 + $0x5e8] ss:$16 sps:$4 sm:$0xff]  }
 0x295   : > { %3276 = vmatpush2.bf16.msra.mxu0 %v4880_v38  ;;  %v4967_v38 = vld [vmem:[#allocation11 + $0x7e8] ss:$16 sps:$4 sm:$0xff]  }
 0x296   : > { %3317 = vmatpush2.bf16.msra.mxu1 %v4883_v40  ;;  %3277 = vmatprep.subr.bf16.mxu0 %v4888_v41  ;;  %v4972_v40 = vld [vmem:[#allocation11 + $0x5cc] ss:$16 sps:$4 sm:$0xff]  }
 0x297   : > { %3318 = vmatprep.subr.bf16.mxu1 %v4891_v59  ;;  %v4975_v41 = vld [vmem:[#allocation11 + $0x7cc] ss:$16 sps:$4 sm:$0xff]   ;;  %v4970_v59 = vld [vmem:[#allocation11 + $0x5c8] ss:$16 sps:$4 sm:$0xff]  }
 0x299   : > { %3278 = vmatpush2.bf16.msra.mxu0 %v4886_v43  ;;  %v4973_v43 = vld [vmem:[#allocation11 + $0x7c8] ss:$16 sps:$4 sm:$0xff]  }
 0x29a   : > { %3319 = vmatpush2.bf16.msra.mxu1 %v4889_v44  ;;  %3279 = vmatprep.subr.bf16.mxu0 %v4894_v45  ;;  %v4978_v44 = vld [vmem:[#allocation11 + $0x5ac] ss:$16 sps:$4 sm:$0xff]  }
 0x29b   : > { %3320 = vmatprep.subr.bf16.mxu1 %v4897_v47  ;;  %v4981_v45 = vld [vmem:[#allocation11 + $0x7ac] ss:$16 sps:$4 sm:$0xff]   ;;  %v4976_v47 = vld [vmem:[#allocation11 + $0x5a8] ss:$16 sps:$4 sm:$0xff]  }
 0x29d   : > { %3280 = vmatpush2.bf16.msra.mxu0 %v4892_v48  ;;  %v4979_v48 = vld [vmem:[#allocation11 + $0x7a8] ss:$16 sps:$4 sm:$0xff]  }
 0x29e   : > { %3321 = vmatpush2.bf16.msra.mxu1 %v4895_v49  ;;  %3281 = vmatprep.subr.bf16.mxu0 %v4900_v50  ;;  %v4984_v49 = vld [vmem:[#allocation11 + $0x58c] ss:$16 sps:$4 sm:$0xff]  }
 0x29f   : > { %3322 = vmatprep.subr.bf16.mxu1 %v4903_v51  ;;  %v4987_v50 = vld [vmem:[#allocation11 + $0x78c] ss:$16 sps:$4 sm:$0xff]   ;;  %v4982_v51 = vld [vmem:[#allocation11 + $0x588] ss:$16 sps:$4 sm:$0xff]  }
 0x2a1   : > { %3282 = vmatpush2.bf16.msra.mxu0 %v4898_v52  ;;  %v4985_v52 = vld [vmem:[#allocation11 + $0x788] ss:$16 sps:$4 sm:$0xff]  }
 0x2a2   : > { %3323 = vmatpush2.bf16.msra.mxu1 %v4901_v57  ;;  %3283 = vmatprep.subr.bf16.mxu0 %v4906_v58  ;;  %v4990_v57 = vld [vmem:[#allocation11 + $0x56c] ss:$16 sps:$4 sm:$0xff]  }
 0x2a3   : > { %3324 = vmatprep.subr.bf16.mxu1 %v4909_v60  ;;  %v4993_v58 = vld [vmem:[#allocation11 + $0x76c] ss:$16 sps:$4 sm:$0xff]   ;;  %v4988_v60 = vld [vmem:[#allocation11 + $0x568] ss:$16 sps:$4 sm:$0xff]  }
 0x2a5   : > { %3284 = vmatpush2.bf16.msra.mxu0 %v4904_v61  ;;  %v4991_v61 = vld [vmem:[#allocation11 + $0x768] ss:$16 sps:$4 sm:$0xff]  }
 0x2a6   : > { %3325 = vmatpush2.bf16.msra.mxu1 %v4907_v62  ;;  %3285 = vmatprep.subr.bf16.mxu0 %v4912_v29  ;;  %v4996_v62 = vld [vmem:[#allocation11 + $0x54c] ss:$16 sps:$4 sm:$0xff]  }
 0x2a7   : > { %3326 = vmatprep.subr.bf16.mxu1 %v4915_v63  ;;  %v4999_v29 = vld [vmem:[#allocation11 + $0x74c] ss:$16 sps:$4 sm:$0xff]   ;;  %v4994_v63 = vld [vmem:[#allocation11 + $0x548] ss:$16 sps:$4 sm:$0xff]  }
 0x2a9   : > { %3286 = vmatpush2.bf16.msra.mxu0 %v4910_v0  ;;  %v4997_v0 = vld [vmem:[#allocation11 + $0x748] ss:$16 sps:$4 sm:$0xff]  }
 0x2aa   : > { %3327 = vmatpush2.bf16.msra.mxu1 %v4913_v1  ;;  %3337 = vmatprep.subr.bf16.mxu0 %v4918_v2  ;;  %v5002_v1 = vld [vmem:[#allocation11 + $0x52c] ss:$16 sps:$4 sm:$0xff]  }
 0x2ab   : > { %3378 = vmatprep.subr.bf16.mxu1 %v4921_v3  ;;  %v5005_v2 = vld [vmem:[#allocation11 + $0x72c] ss:$16 sps:$4 sm:$0xff]   ;;  %v5000_v3 = vld [vmem:[#allocation11 + $0x528] ss:$16 sps:$4 sm:$0xff]  }
 0x2ac   : > { %3288 = vmatmul.mubr.bf16.vlgmr.msra.gmra.mxu0 %v5777_v12  ;;  %v4934_v12 = vld [vmem:[#allocation11 + $0x488] ss:$16 sps:$4 sm:$0xff]  }
 0x2ad   : > { %3329 = vmatmul.mubr.bf16.vlgmr.msra.gmra.mxu1 %v5779_v13  ;;  %3338 = vmatpush1.bf16.msra.mxu0 %v4916_v4  ;;  %v4937_v13 = vld [vmem:[#allocation11 + $0x688] ss:$16 sps:$4 sm:$0xff]  }
 0x2ae   : > { %3379 = vmatpush1.bf16.msra.mxu1 %v4919_v5  ;;  %3339 = vmatprep.subr.bf16.mxu0 %v4924_v6  ;;  %v5003_v4 = vld [vmem:[#allocation11 + $0x728] ss:$16 sps:$4 sm:$0xff]   ;;  %v5008_v5 = vld [vmem:[#allocation11 + $0x50c] ss:$16 sps:$4 sm:$0xff]  }
 0x2af   : > { %3380 = vmatprep.subr.bf16.mxu1 %v4927_v42  ;;  %3369 = vmatprep.mubr.bf16.mxu0 %v5793_v8  ;;  %v4943_v8 = vld [vmem:[#allocation11 + $0x668] ss:$16 sps:$4 sm:$0xff]   ;;  %v5011_v6 = vld [vmem:[#allocation11 + $0x70c] ss:$16 sps:$4 sm:$0xff]  }
 0x2b0   : > { %3410 = vmatprep.mubr.bf16.mxu1 %v5795_v9  ;;  %v4948_v9 = vld [vmem:[#allocation11 + $0x44c] ss:$16 sps:$4 sm:$0xff]   ;;  %v5006_v42 = vld [vmem:[#allocation11 + $0x508] ss:$16 sps:$4 sm:$0xff]  }
 0x2b1   : > { %3340 = vmatpush1.bf16.msra.mxu0 %v4922_v46  ;;  %v5009_v46 = vld [vmem:[#allocation11 + $0x708] ss:$16 sps:$4 sm:$0xff]  }
 0x2b2   : > { %3381 = vmatpush1.bf16.msra.mxu1 %v4925_v55  ;;  %3341 = vmatprep.subr.bf16.mxu0 %v4930_v56  ;;  %v5014_v55 = vld [vmem:[#allocation13 + $0x74] ss:$8 sps:$4 sm:$0xff]   ;;  %v5012_v56 = vld [vmem:[#allocation13 + $0x70] ss:$8 sps:$4 sm:$0xff]  }
 0x2b3   : > { %3382 = vmatprep.subr.bf16.mxu1 %v4933_v7  ;;  %v5017_v7 = vld [vmem:[#allocation13 + $0x64] ss:$8 sps:$4 sm:$0xff]  }
 0x2b5   : > { %3342 = vmatpush1.bf16.msra.mxu0 %v4928_v10 }
 0x2b6   : > { %3383 = vmatpush1.bf16.msra.mxu1 %v4931_v11  ;;  %3343 = vmatprep.subr.bf16.mxu0 %v4936_v39  ;;  %v5015_v39 = vld [vmem:[#allocation13 + $0x60] ss:$8 sps:$4 sm:$0xff]  }
 0x2b7   : > { %3384 = vmatprep.subr.bf16.mxu1 %v4939_v15 }
 0x2b9   : > { %3344 = vmatpush1.bf16.msra.mxu0 %v4934_v12 }
 0x2ba   : > { %3385 = vmatpush1.bf16.msra.mxu1 %v4937_v13  ;;  %3345 = vmatprep.subr.bf16.mxu0 %v4942_v16  ;;  %v5020_v13 = vld [vmem:[#allocation13 + $0x54] ss:$8 sps:$4 sm:$0xff]  }
 0x2bb   : > { %3386 = vmatprep.subr.bf16.mxu1 %v4945_v17 }
 0x2bd   : > { %3346 = vmatpush1.bf16.msra.mxu0 %v4940_v18  ;;  %v5018_v18 = vld [vmem:[#allocation13 + $0x50] ss:$8 sps:$4 sm:$0xff]  }
 0x2be   : > { %3387 = vmatpush1.bf16.msra.mxu1 %v4943_v8  ;;  %3347 = vmatprep.subr.bf16.mxu0 %v4948_v9 }
 0x2bf   : > { %3388 = vmatprep.subr.bf16.mxu1 %v4951_v20  ;;  %v5023_v20 = vld [vmem:[#allocation13 + $0x44] ss:$8 sps:$4 sm:$0xff]  }
 0x2c1   : > { %3348 = vmatpush1.bf16.msra.mxu0 %v4946_v21  ;;  %v5060_v21 = vld [vmem:[#allocation13 + $0x170] ss:$8 sps:$4 sm:$0xff]  }
 0x2c2   : > { %3389 = vmatpush1.bf16.msra.mxu1 %v4949_v22  ;;  %3349 = vmatprep.subr.bf16.mxu0 %v4954_v23  ;;  %v5065_v22 = vld [vmem:[#allocation13 + $0x164] ss:$8 sps:$4 sm:$0xff]   ;;  %v5063_v23 = vld [vmem:[#allocation13 + $0x160] ss:$8 sps:$4 sm:$0xff]  }
 0x2c3   : > { %3390 = vmatprep.subr.bf16.mxu1 %v4957_v25  ;;  %v5026_v25 = vld [vmem:[#allocation13 + $0x34] ss:$8 sps:$4 sm:$0xff]  }
 0x2c5   : > { %3350 = vmatpush1.bf16.msra.mxu0 %v4952_v26  ;;  %v5068_v26 = vld [vmem:[#allocation13 + $0x154] ss:$8 sps:$4 sm:$0xff]  }
 0x2c6   : > { %3391 = vmatpush1.bf16.msra.mxu1 %v4955_v27  ;;  %3351 = vmatprep.subr.bf16.mxu0 %v4960_v28  ;;  %v5024_v27 = vld [vmem:[#allocation13 + $0x30] ss:$8 sps:$4 sm:$0xff]  }
 0x2c7   : > { %3392 = vmatprep.subr.bf16.mxu1 %v4963_v30  ;;  %v5066_v28 = vld [vmem:[#allocation13 + $0x150] ss:$8 sps:$4 sm:$0xff]   ;;  %v5029_v30 = vld [vmem:[#allocation13 + $0x24] ss:$8 sps:$4 sm:$0xff]  }
 0x2c9   : > { %3352 = vmatpush1.bf16.msra.mxu0 %v4958_v33  ;;  %v5071_v33 = vld [vmem:[#allocation13 + $0x144] ss:$8 sps:$4 sm:$0xff]  }
 0x2ca   : > { %3393 = vmatpush1.bf16.msra.mxu1 %v4961_v34  ;;  %3353 = vmatprep.subr.bf16.mxu0 %v4966_v35  ;;  %v5027_v34 = vld [vmem:[#allocation13 + $0x20] ss:$8 sps:$4 sm:$0xff]  }
 0x2cb   : > { %3394 = vmatprep.subr.bf16.mxu1 %v4969_v36  ;;  %v5069_v35 = vld [vmem:[#allocation13 + $0x140] ss:$8 sps:$4 sm:$0xff]   ;;  %v5032_v36 = vld [vmem:[#allocation13 + $0x14] ss:$8 sps:$4 sm:$0xff]  }
 0x2cd   : > { %3354 = vmatpush2.bf16.msra.mxu0 %v4964_v37  ;;  %v5074_v37 = vld [vmem:[#allocation13 + $0x134] ss:$8 sps:$4 sm:$0xff]  }
 0x2ce   : > { %3395 = vmatpush2.bf16.msra.mxu1 %v4967_v38  ;;  %3355 = vmatprep.subr.bf16.mxu0 %v4972_v40  ;;  %v5030_v38 = vld [vmem:[#allocation13 + $0x10] ss:$8 sps:$4 sm:$0xff]  }
 0x2cf   : > { %3396 = vmatprep.subr.bf16.mxu1 %v4975_v41  ;;  %v5072_v40 = vld [vmem:[#allocation13 + $0x130] ss:$8 sps:$4 sm:$0xff]   ;;  %v5035_v41 = vld [vmem:[#allocation13 + $0x4] ss:$8 sps:$4 sm:$0xff]  }
 0x2d1   : > { %3356 = vmatpush2.bf16.msra.mxu0 %v4970_v59  ;;  %v5077_v59 = vld [vmem:[#allocation13 + $0x124] ss:$8 sps:$4 sm:$0xff]  }
 0x2d2   : > { %3397 = vmatpush2.bf16.msra.mxu1 %v4973_v43  ;;  %3357 = vmatprep.subr.bf16.mxu0 %v4978_v44  ;;  %v5033_v43 = vld [vmem:[#allocation13] ss:$8 sps:$4 sm:$0xff]  }
 0x2d3   : > { %3398 = vmatprep.subr.bf16.mxu1 %v4981_v45  ;;  %v5075_v44 = vld [vmem:[#allocation13 + $0x120] ss:$8 sps:$4 sm:$0xff]   ;;  %v5038_v45 = vld [vmem:[#allocation13 + $0xf4] ss:$8 sps:$4 sm:$0xff]  }
 0x2d5   : > { %3358 = vmatpush2.bf16.msra.mxu0 %v4976_v47  ;;  %v5080_v47 = vld [vmem:[#allocation13 + $0x114] ss:$8 sps:$4 sm:$0xff]  }
 0x2d6   : > { %3399 = vmatpush2.bf16.msra.mxu1 %v4979_v48  ;;  %3359 = vmatprep.subr.bf16.mxu0 %v4984_v49  ;;  %v5036_v48 = vld [vmem:[#allocation13 + $0xf0] ss:$8 sps:$4 sm:$0xff]  }
 0x2d7   : > { %3400 = vmatprep.subr.bf16.mxu1 %v4987_v50  ;;  %v5078_v49 = vld [vmem:[#allocation13 + $0x110] ss:$8 sps:$4 sm:$0xff]   ;;  %v5041_v50 = vld [vmem:[#allocation13 + $0xe4] ss:$8 sps:$4 sm:$0xff]  }
 0x2d9   : > { %3360 = vmatpush2.bf16.msra.mxu0 %v4982_v51  ;;  %v5083_v51 = vld [vmem:[#allocation13 + $0x104] ss:$8 sps:$4 sm:$0xff]  }
 0x2da   : > { %3401 = vmatpush2.bf16.msra.mxu1 %v4985_v52  ;;  %3361 = vmatprep.subr.bf16.mxu0 %v4990_v57  ;;  %v5039_v52 = vld [vmem:[#allocation13 + $0xe0] ss:$8 sps:$4 sm:$0xff]  }
 0x2db   : > { %3402 = vmatprep.subr.bf16.mxu1 %v4993_v58  ;;  %v5081_v57 = vld [vmem:[#allocation13 + $0x100] ss:$8 sps:$4 sm:$0xff]   ;;  %v5044_v58 = vld [vmem:[#allocation13 + $0xd4] ss:$8 sps:$4 sm:$0xff]  }
 0x2dd   : > { %3362 = vmatpush2.bf16.msra.mxu0 %v4988_v60  ;;  %v5086_v60 = vld [vmem:[#allocation13 + $0x1f4] ss:$8 sps:$4 sm:$0xff]  }
 0x2de   : > { %3403 = vmatpush2.bf16.msra.mxu1 %v4991_v61  ;;  %3363 = vmatprep.subr.bf16.mxu0 %v4996_v62  ;;  %v5042_v61 = vld [vmem:[#allocation13 + $0xd0] ss:$8 sps:$4 sm:$0xff]  }
 0x2df   : > { %3404 = vmatprep.subr.bf16.mxu1 %v4999_v29  ;;  %v5084_v62 = vld [vmem:[#allocation13 + $0x1f0] ss:$8 sps:$4 sm:$0xff]   ;;  %v5047_v29 = vld [vmem:[#allocation13 + $0xc4] ss:$8 sps:$4 sm:$0xff]  }
 0x2e1   : > { %3364 = vmatpush2.bf16.msra.mxu0 %v4994_v63  ;;  %v5089_v63 = vld [vmem:[#allocation13 + $0x1e4] ss:$8 sps:$4 sm:$0xff]  }
 0x2e2   : > { %3405 = vmatpush2.bf16.msra.mxu1 %v4997_v0  ;;  %3365 = vmatprep.subr.bf16.mxu0 %v5002_v1  ;;  %v5045_v0 = vld [vmem:[#allocation13 + $0xc0] ss:$8 sps:$4 sm:$0xff]  }
 0x2e3   : > { %3406 = vmatprep.subr.bf16.mxu1 %v5005_v2  ;;  %v5087_v1 = vld [vmem:[#allocation13 + $0x1e0] ss:$8 sps:$4 sm:$0xff]   ;;  %v5050_v2 = vld [vmem:[#allocation13 + $0xb4] ss:$8 sps:$4 sm:$0xff]  }
 0x2e5   : > { %3366 = vmatpush2.bf16.msra.mxu0 %v5000_v3  ;;  %v5092_v3 = vld [vmem:[#allocation13 + $0x1d4] ss:$8 sps:$4 sm:$0xff]  }
 0x2e6   : > { %3407 = vmatpush2.bf16.msra.mxu1 %v5003_v4  ;;  %3367 = vmatprep.subr.bf16.mxu0 %v5008_v5  ;;  %v5048_v4 = vld [vmem:[#allocation13 + $0xb0] ss:$8 sps:$4 sm:$0xff]  }
 0x2e7   : > { %3408 = vmatprep.subr.bf16.mxu1 %v5011_v6  ;;  %v5090_v5 = vld [vmem:[#allocation13 + $0x1d0] ss:$8 sps:$4 sm:$0xff]   ;;  %v5053_v6 = vld [vmem:[#allocation13 + $0xa4] ss:$8 sps:$4 sm:$0xff]  }
 0x2e9   : > { %3368 = vmatpush2.bf16.msra.mxu0 %v5006_v42  ;;  %v5095_v42 = vld [vmem:[#allocation13 + $0x1c4] ss:$8 sps:$4 sm:$0xff]  }
 0x2ea   : > { %3409 = vmatpush2.bf16.msra.mxu1 %v5009_v46  ;;  %3832 = vmatprep.subr.bf16.mxu0 %v5014_v55  ;;  %v5051_v46 = vld [vmem:[#allocation13 + $0xa0] ss:$8 sps:$4 sm:$0xff]  }
 0x2eb   : > { %v5093_v55 = vld [vmem:[#allocation13 + $0x1c0] ss:$8 sps:$4 sm:$0xff]  }
 0x2ec   : > { %v5820_v10 = vpop.f32.mrf.mxu0  ;;  %3370 = vmatmul.mubr.bf16.vlgmr.msra.gmra.mxu0 %v5806_v53  ;;  %v5062_v53 = vld [vmem:[#allocation13 + $0x174] ss:$8 sps:$4 sm:$0xff]  }
 0x2ed   : > { %v5822_v11 = vpop.f32.mrf.mxu1  ;;  %3411 = vmatmul.mubr.bf16.vlgmr.msra.gmra.mxu1 %v5810_v54  ;;  %3833 = vmatpush1.bf16.msra.mxu0 %v5012_v56  ;;  %v5021_v54 = vld [vmem:[#allocation13 + $0x40] ss:$8 sps:$4 sm:$0xff]   ;;  %v5056_v56 = vld [vmem:[#allocation13 + $0x94] ss:$8 sps:$4 sm:$0xff]  }
 0x2ee   : > { %v5826_v15 = vpop.f32.mrf.mxu0  ;;  %3834 = vmatprep.subr.bf16.mxu0 %v5017_v7  ;;  %3873 = vmatprep.subr.bf16.mxu1 %v5062_v53  ;;  %v5098_v7 = vld [vmem:[#allocation13 + $0x1b4] ss:$8 sps:$4 sm:$0xff]  }
 0x2ef   : > { %v5828_v12 = vpop.f32.mrf.mxu1  ;;  %3874 = vmatpush1.bf16.msra.mxu1 %v5060_v21 }
 0x2f0   : > { %v3129_v16 = vpop.f32.mrf.mxu0  ;;  %3875 = vmatprep.subr.bf16.mxu1 %v5065_v22  ;;  %v5101_v22 = vld [vmem:[#allocation13 + $0x1a4] ss:$8 sps:$4 sm:$0xff]  }
 0x2f1   : > { %v3170_v17 = vpop.f32.mrf.mxu1  ;;  %3835 = vmatpush1.bf16.msra.mxu0 %v5015_v39  ;;  %v5833_v39 = vld [vmem:[%s5880_s5] sm:$0xf] }
 0x2f2   : > { %v3130_v8 = vpop.f32.mrf.mxu0  ;;  %3836 = vmatprep.subr.bf16.mxu0 %v5020_v13  ;;  %v5054_v13 = vld [vmem:[#allocation13 + $0x90] ss:$8 sps:$4 sm:$0xff]   ;;  %v5059_v17 = vld [vmem:[#allocation13 + $0x84] ss:$8 sps:$4 sm:$0xff]  }
 0x2f3   : > { %v3171_v9 = vpop.f32.mrf.mxu1  ;;  %3876 = vmatpush1.bf16.msra.mxu1 %v5063_v23  ;;  %v5096_v16 = vld [vmem:[#allocation13 + $0x1b0] ss:$8 sps:$4 sm:$0xff]   ;;  %v1798_v8 = vrot.slane %v5833_v39, %v5738_v14 }
 0x2f4   : > { %3877 = vmatprep.subr.bf16.mxu1 %v5068_v26  ;;  %v5057_v9 = vld [vmem:[#allocation13 + $0x80] ss:$8 sps:$4 sm:$0xff]  }
 0x2f5   : > { %3837 = vmatpush1.bf16.msra.mxu0 %v5018_v18  ;;  %v1794_v18 = vrot.slane %v5833_v39, %v5745_v31  ;;  %v3128_v21 = vadd.f32 %v5826_v15, %v1798_v8 }
 0x2f6   : > { %3838 = vmatprep.subr.bf16.mxu0 %v5023_v20 }
 0x2f7   : > { %3878 = vmatpush1.bf16.msra.mxu1 %v5066_v28  ;;  %v3126_v20 = vadd.f32 %v5820_v10, %v1794_v18  ;;  %v3169_v26 = vadd.f32 %v5828_v12, %v3128_v21  ;;  %v3423_v28 = vstv %s4207_s30  ;;  %v5104_v10 = vld [vmem:[#allocation13 + $0x194] ss:$8 sps:$4 sm:$0xff]  }
 0x2f8   : > { %3879 = vmatprep.subr.bf16.mxu1 %v5071_v33 }
 0x2f9   : > { %3839 = vmatpush1.bf16.msra.mxu0 %v5021_v54  ;;  %v3167_v53 = vadd.f32 %v5822_v11, %v3126_v20 }
 0x2fa   : > { %3840 = vmatprep.subr.bf16.mxu0 %v5026_v25  ;;  %v5099_v25 = vld [vmem:[#allocation13 + $0x1a0] ss:$8 sps:$4 sm:$0xff]  }
 0x2fb   : > { %3880 = vmatpush1.bf16.msra.mxu1 %v5069_v35 }
 0x2fc   : > { %3881 = vmatprep.subr.bf16.mxu1 %v5074_v37  ;;  %v5102_v37 = vld [vmem:[#allocation13 + $0x190] ss:$8 sps:$4 sm:$0xff]  }
 0x2fd   : > { %3841 = vmatpush1.bf16.msra.mxu0 %v5024_v27 }
 0x2fe   : > { %3842 = vmatprep.subr.bf16.mxu0 %v5029_v30 }
 0x2ff   : > { %3882 = vmatpush1.bf16.msra.mxu1 %v5072_v40 }
 0x300   : > { %3883 = vmatprep.subr.bf16.mxu1 %v5077_v59  ;;  %v5107_v59 = vld [vmem:[#allocation13 + $0x184] ss:$8 sps:$4 sm:$0xff]  }
 0x301   : > { %3843 = vmatpush1.bf16.msra.mxu0 %v5027_v34 }
 0x302   : > { %3844 = vmatprep.subr.bf16.mxu0 %v5032_v36 }
 0x303   : > { %3884 = vmatpush1.bf16.msra.mxu1 %v5075_v44  ;;  %v5105_v44 = vld [vmem:[#allocation13 + $0x180] ss:$8 sps:$4 sm:$0xff]  }
 0x304   : > { %3885 = vmatprep.subr.bf16.mxu1 %v5080_v47 }
 0x305   : > { %3845 = vmatpush1.bf16.msra.mxu0 %v5030_v38 }
 0x306   : > { %3846 = vmatprep.subr.bf16.mxu0 %v5035_v41 }
 0x307   : > { %3886 = vmatpush1.bf16.msra.mxu1 %v5078_v49 }
 0x308   : > { %3887 = vmatprep.subr.bf16.mxu1 %v5083_v51 }
 0x309   : > { %3847 = vmatpush1.bf16.msra.mxu0 %v5033_v43 }
 0x30a   : > { %3848 = vmatprep.subr.bf16.mxu0 %v5038_v45 }
 0x30b   : > { %3888 = vmatpush1.bf16.msra.mxu1 %v5081_v57 }
 0x30c   : > { %3889 = vmatprep.subr.bf16.mxu1 %v5086_v60 }
 0x30d   : > { %3849 = vmatpush2.bf16.msra.mxu0 %v5036_v48 }
 0x30e   : > { %3850 = vmatprep.subr.bf16.mxu0 %v5041_v50 }
 0x30f   : > { %3890 = vmatpush2.bf16.msra.mxu1 %v5084_v62  ;;  %v1802_v62 = vrot.slane %v5833_v39, %v1462_v32 }
 0x310   : > { %3891 = vmatprep.subr.bf16.mxu1 %v5089_v63 }
 0x311   : > { %3851 = vmatpush2.bf16.msra.mxu0 %v5039_v52 }
 0x312   : > { %3852 = vmatprep.subr.bf16.mxu0 %v5044_v58 }
 0x313   : > { %3892 = vmatpush2.bf16.msra.mxu1 %v5087_v1 }
 0x314   : > { %3893 = vmatprep.subr.bf16.mxu1 %v5092_v3 }
 0x315   : > { %3853 = vmatpush2.bf16.msra.mxu0 %v5042_v61 }
 0x316   : > { %3854 = vmatprep.subr.bf16.mxu0 %v5047_v29  ;;  %v1806_v29 = vrot.slane %v5833_v39, %v1466_v24 }
 0x317   : > { %3894 = vmatpush2.bf16.msra.mxu1 %v5090_v5 }
 0x318   : > { %3895 = vmatprep.subr.bf16.mxu1 %v5095_v42 }
 0x319   : > { %3855 = vmatpush2.bf16.msra.mxu0 %v5045_v0 }
 0x31a   : > { %3856 = vmatprep.subr.bf16.mxu0 %v5050_v2 }
 0x31b   : > { %3896 = vmatpush2.bf16.msra.mxu1 %v5093_v55 }
 0x31c   : > { %3897 = vmatprep.subr.bf16.mxu1 %v5098_v7 }
 0x31d   : > { %3857 = vmatpush2.bf16.msra.mxu0 %v5048_v4 }
 0x31e   : > { %3858 = vmatprep.subr.bf16.mxu0 %v5053_v6 }
 0x31f   : > { %3898 = vmatpush2.bf16.msra.mxu1 %v5096_v16 }
 0x320   : > { %3899 = vmatprep.subr.bf16.mxu1 %v5101_v22  ;;  %v3500_v22 = vld [vmem:[%s5882_s7] sm:$0x3] }
 0x321   : > { %3859 = vmatpush2.bf16.msra.mxu0 %v5051_v46 }
 0x322   : > { %3860 = vmatprep.subr.bf16.mxu0 %v5056_v56 }
 0x323   : > { %3900 = vmatpush2.bf16.msra.mxu1 %v5099_v25 }
 0x324   : > { %3901 = vmatprep.subr.bf16.mxu1 %v5104_v10 }
 0x325   : > { %3861 = vmatpush2.bf16.msra.mxu0 %v5054_v13 }
 0x326   : > { %3862 = vmatprep.subr.bf16.mxu0 %v5059_v17 }
 0x327   : > { %3902 = vmatpush2.bf16.msra.mxu1 %v5102_v37 }
 0x328   : > { %3903 = vmatprep.subr.bf16.mxu1 %v5107_v59 }
 0x329   : > { %3863 = vmatpush2.bf16.msra.mxu0 %v5057_v9 }
 0x32b   : > { %3904 = vmatpush2.bf16.msra.mxu1 %v5105_v44  ;;  %v4529_v44 = vld [vmem:[#allocation3] ss:$0 sm:$0xff] }
 0x32c   : > { %v3207_v54 = vpop.f32.mrf.mxu0 }
 0x32d   : > { %v3248_v23 = vpop.f32.mrf.mxu1  ;;  %v3208_v27 = vadd.f32 %v3207_v54, %v3167_v53  ;;  %v3505_v54 = vrot.slane %v3500_v22, %v5745_v31 }
 0x32e   : > { %v3209_v30 = vpop.f32.mrf.mxu0 }
 0x32f   : > { %v3250_v33 = vpop.f32.mrf.mxu1  ;;  %v3249_v34 = vadd.f32 %v3248_v23, %v3208_v27  ;;  %v3210_v35 = vadd.f32 %v3209_v30, %v3169_v26  ;;  %v3509_v23 = vrot.slane %v3500_v22, %v5738_v14  ;;  %v3916_v27 = vstv %s4208_s25 }
 0x330   : > { %v3211_v36 = vpop.f32.mrf.mxu0 }
 0x331   : > { %v3252_v15 = vpop.f32.mrf.mxu1  ;;  %vm3419_vm8 = vcmp.gt.f32.partialorder %v3249_v34, 0.0  ;;  %v3424_v11 = vmul.f32 %v3423_v28, %v3249_v34  ;;  %v3251_v38 = vadd.f32 %v3250_v33, %v3210_v35  ;;  %v3921_v33 = vld [vmem:[%s5883_s8] sm:$0x3] }
 0x332   : > { %v3212_v40 = vpop.f32.mrf.mxu0  ;;  %v3926_v15 = vrot.slane %v3921_v33, %v5745_v31  ;;  %v3930_v37 = vrot.slane %v3921_v33, %v5738_v14 }
 0x333   : > { %v3253_v41 = vpop.f32.mrf.mxu1  ;;  %vm3420_vm9 = vcmp.gt.f32.partialorder %v3251_v38, 0.0  ;;  %v3425_v12 = vmul.f32 %v3423_v28, %v3251_v38  ;;  %v3428_v43 = vsel %vm3419_vm8, %v3249_v34, %v3424_v11 }
 0x334   : > { %v3432_v48 = vpack.c.bf16 %v3428_v43, %v3428_v43 }
 0x335   : > { %v3429_v45 = vsel %vm3420_vm9, %v3251_v38, %v3425_v12 }
 0x336   : > { %v3433_v47 = vpack.c.bf16 %v3429_v45, %v3429_v45 }
 0x338   : > { %3864 = vmatprep.mubr.bf16.mxu0 %v3433_v47 }
 0x339   : > { %3865 = vmatmul.mubr.bf16.vlgmr.msra.gmra.mxu0 %v3432_v48 }
 0x36c   : > { %v3289_v49 = vpop.f32.mrf.mxu0 }
 0x36d   : > { %v3330_v50 = vpop.f32.mrf.mxu1  ;;  %v3290_v63 = vadd.f32 %v3289_v49, %v1802_v62 }
 0x36e   : > { %v3291_v51 = vpop.f32.mrf.mxu0 }
 0x36f   : > { %v3332_v52 = vpop.f32.mrf.mxu1  ;;  %v3292_v0 = vadd.f32 %v3291_v51, %v1806_v29  ;;  %v3331_v1 = vadd.f32 %v3330_v50, %v3290_v63 }
 0x370   : > { %v3293_v57 = vpop.f32.mrf.mxu0 }
 0x371   : > { %v3334_v58 = vpop.f32.mrf.mxu1  ;;  %v3333_v4 = vadd.f32 %v3332_v52, %v3292_v0 }
 0x372   : > { %v3294_v60 = vpop.f32.mrf.mxu0 }
 0x373   : > { %v3335_v61 = vpop.f32.mrf.mxu1 }
 0x3ac   : > { %v3371_v2 = vpop.f32.mrf.mxu0 }
 0x3ad   : > { %v3412_v3 = vpop.f32.mrf.mxu1  ;;  %v3372_v5 = vadd.f32 %v3371_v2, %v3331_v1 }
 0x3ae   : > { %v3373_v6 = vpop.f32.mrf.mxu0 }
 0x3af   : > { %v3414_v42 = vpop.f32.mrf.mxu1  ;;  %v3413_v46 = vadd.f32 %v3412_v3, %v3372_v5  ;;  %v3374_v55 = vadd.f32 %v3373_v6, %v3333_v4 }
 0x3b0   : > { %v3375_v56 = vpop.f32.mrf.mxu0 }
 0x3b1   : > { %v3416_v7 = vpop.f32.mrf.mxu1  ;;  %vm3421_vm10 = vcmp.gt.f32.partialorder %v3413_v46, 0.0  ;;  %v3426_v13 = vmul.f32 %v3423_v28, %v3413_v46  ;;  %v3415_v32 = vadd.f32 %v3414_v42, %v3374_v55 }
 0x3b2   : > { %v3376_v16 = vpop.f32.mrf.mxu0 }
 0x3b3   : > { %v3417_v19 = vpop.f32.mrf.mxu1  ;;  %vm3422_vm11 = vcmp.gt.f32.partialorder %v3415_v32, 0.0  ;;  %v3427_v24 = vmul.f32 %v3423_v28, %v3415_v32  ;;  %v3430_v39 = vsel %vm3421_vm10, %v3413_v46, %v3426_v13 }
 0x3b4   : > { %v3434_v8 = vpack.c.bf16 %v3430_v39, %v3430_v39 }
 0x3b5   : > { %v3431_v17 = vsel %vm3422_vm11, %v3415_v32, %v3427_v24 }
 0x3b6   : > { %v3435_v18 = vpack.c.bf16 %v3431_v17, %v3431_v17 }
 0x3b8   : > { %3905 = vmatprep.mubr.bf16.mxu1 %v3435_v18 }
 0x3b9   : > { %3906 = vmatmul.mubr.bf16.vlgmr.msra.gmra.mxu1 %v3434_v8 }
 0x3f9   : > { %v3866_v9 = vpop.f32.mrf.mxu0 }
 0x3fa   : > { %v3867_v25 = vadd.f32 %v3866_v9, %v3505_v54 }
 0x3fb   : > { %v3868_v20 = vpop.f32.mrf.mxu0 }
 0x3fc   : > { %v3869_v28 = vadd.f32 %v3868_v20, %v3509_v23 }
 0x3fd   : > { %v3870_v21 = vpop.f32.mrf.mxu0 }
 0x3ff   : > { %v3871_v53 = vpop.f32.mrf.mxu0 }
 0x479   : > { %v3907_v26 = vpop.f32.mrf.mxu1 }
 0x47a   : > { %v3908_v30 = vadd.f32 %v3907_v26, %v3867_v25 }
 0x47b   : > { %v3909_v34 = vpop.f32.mrf.mxu1 }
 0x47c   : > { %vm3914_vm12 = vcmp.gt.f32.partialorder %v3908_v30, 0.0  ;;  %v3917_v35 = vmul.f32 %v3916_v27, %v3908_v30  ;;  %v3910_v10 = vadd.f32 %v3909_v34, %v3869_v28 }
 0x47d   : > { %v3911_v36 = vpop.f32.mrf.mxu1 }
 0x47e   : > { %vm3915_vm13 = vcmp.gt.f32.partialorder %v3910_v10, 0.0  ;;  %v3918_v11 = vmul.f32 %v3916_v27, %v3910_v10  ;;  %v3919_v38 = vsel %vm3914_vm12, %v3908_v30, %v3917_v35 }
 0x47f   : > { %v3912_v40 = vpop.f32.mrf.mxu1  ;;  %v3933_v12 = vmul.f32 %v3926_v15, %v3919_v38 }
 0x480   : > { %v3920_v41 = vsel %vm3915_vm13, %v3910_v10, %v3918_v11 }
 0x481   : > { %v3934_v59 = vmul.f32 %v3930_v37, %v3920_v41 }
 0x483   : > { %v3935_v43 = vadd.f32 %v3934_v59, %v3933_v12 }
 0x485   : > { %3936 = vadd.xlane.f32.xlu0 %v3935_v43 }
 0x50e   : > { %v3937_v45 = vpop.xlane.xlu0 %3936 }
 0x50f   : > { %v3945_v47 = vadd.f32 %v4529_v44, %v3937_v45 }
 0x511   : > { %v4530_v48 = vmul.f32 -1.442695, %v3945_v47 }
 0x513   : > { %5108 = vpow2.f32 %v4530_v48 }
 0x520   : > { %v5109_v49 = vpop.eup %5108 }
 0x521   : > { %v3949_v50 = vadd.f32 1.0, %v5109_v49 }
 0x523   : > { %5110 = vrcp.f32 %v3949_v50 }
 0x530   : > { %v5111_v31 = vpop.eup %5110 }
 0x531   : > { %3953 = vst.msk [vmem:[%s5885_s10] sm:$0xff] %vm3952_vm14, %v5111_v31 }
 0x532 PF: > { %p27_p13 = scmp.ge.s32.totalorder %s5472_s11, 4   ;;  %s5904_s15 = smov %s5303_s16 }
 0x533   : > { %s5905_s16 = smov %s5307_s17  ;;  %s5906_s17 = smov %s5484_s14 }
 0x534   : > { %s5907_s18 = smov %s5472_s11  ;;  %29 = sbr.rel (!%p27_p13) target bundleno = 10 (0xa), region = 134 }
 0x539   :  { %3965 = vsyncpa [#allocation5], 1 }
 0x53a   :  { %3967 = vsyncpa [#allocation5 + $0x1], 1 }
 0x53b   :  { %3968 = vsyncpa [#allocation9], 1 }
 0x53c   :  { %3970 = vsyncpa [#allocation9 + $0x1], 1 }
 0x53d   :  { %3971 = vsyncpa [#allocation12], 1 }
 0x53e   :  { %3972 = vsyncpa [#allocation6], 1 }
 0x53f   :  { %3974 = vsyncpa [#allocation6 + $0x1], 1 }

</bundles_post_ra>
